<compile_context>
chip_gen: v7x
topology: tpu7x:2x2x1
jax: 0.10.0
libtpu: 0.0.40
codegen_flags: <defaults>
</compile_context>

<pallas_src>
import functools

import jax
import jax.numpy as jnp
from jax.experimental import pallas as pl
from jax.experimental.pallas import tpu as pltpu


# ------------------------------------------------------------------
# Fused SC kernel: 4 matmuls with bias+ReLU between them, no relayouts.
# ------------------------------------------------------------------
def _sc_fused_kernel(x_ref, w_in_ref, b_in_ref, w1_ref, b1_ref,
                     w2_ref, b2_ref, w_out_ref, b_out_ref, o_ref, *, pack):
    cdt = w_in_ref.dtype            # MXU input dtype (bf16 by default)

    # conv1x1_in (+ folded BN scale) + shift + ReLU
    y = jnp.dot(x_ref[...], w_in_ref[...], preferred_element_type=jnp.float32)
    y = jnp.maximum(y + b_in_ref[...], 0.0).astype(cdt)

    # conv1 (1,k,k) valid: one dense matmul against the block-structured
    # weight; output lanes ordered (output position p, channel).
    y = jnp.dot(y, w1_ref[...], preferred_element_type=jnp.float32)
    y = jnp.maximum(y + b1_ref[...], 0.0).astype(cdt)

    # conv2 (1,k,k) valid: spatial collapses to 1x1 -> one matmul.
    y = jnp.dot(y, w2_ref[...], preferred_element_type=jnp.float32)
    y = jnp.maximum(y + b2_ref[...], 0.0).astype(cdt)

    # conv1x1_out (+ folded BN), no ReLU.
    y = jnp.dot(y, w_out_ref[...], preferred_element_type=jnp.float32)
    y = y + b_out_ref[...]

    if pack > 1:
        # Lane-dense store: (bm, c4) -> (bm/pack, pack*c4) so the vst is
        # unmasked 128-lane instead of a 25%-utilized masked store.
        y = y.reshape(y.shape[0] // pack, pack * y.shape[1])
    o_ref[...] = y.astype(o_ref.dtype)


def _round_up(n, m):
    return ((n + m - 1) // m) * m


def _pick_block_m(m, row_bytes, budget_bytes=8 << 20, cap=256):
    """VMEM-aware row-block pick: multiple of 8, divides M, fits the budget,
    prefers grid >= 2 (megacore), capped at `cap`."""
    cands = [bm for bm in range(8, min(m, cap) + 1, 8)
             if m % bm == 0 and bm * row_bytes <= budget_bytes]
    multi = [bm for bm in cands if m // bm >= 2]
    if multi:
        return max(multi)
    if cands:
        return max(cands)
    return m          # fallback: single block covering everything


# ------------------------------------------------------------------
# Full SC forward: layout glue + BN folding + block-weight build in JAX,
# all compute in one Pallas kernel.
# ------------------------------------------------------------------
def sc_forward(x, params, *, k=3, compute_dtype=jnp.bfloat16):
    b, c0, h, w, u, v = x.shape
    # The module's final view(b, c, h, w) requires the two valid (1,k,k)
    # convolutions to collapse (u, v) to (1, 1).
    assert u == v == 2 * (k - 1) + 1, "SC forward requires u == v == 2*k - 1"
    M = b * h * w
    uv = u * v
    u1 = v1 = u - k + 1             # conv1 output grid (== (k, k))
    kk = k * k

    c1 = params["w_in"].shape[1]
    c2 = params["w1"].shape[2]
    c3 = params["w2"].shape[2]
    c4 = params["w_out"].shape[1]
    f32 = jnp.float32

    # ---- one-time weight prep: fold BN scale, build block-structured mats --
    # (In a real deployment these would be precomputed once, not per call.)
    w_in_f = (params["w_in"] * params["s_in"][None, :]).astype(f32)        # (c0, c1)
    w_in_big = jnp.kron(jnp.eye(uv, dtype=f32), w_in_f)                    # (uv*c0, uv*c1)

    w1_f = (params["w1"] * params["s1"][None, None, :]).astype(f32)        # (kk, c1, c2)
    w1_big = jnp.zeros((uv * c1, kk * c2), f32)
    for i in range(u1):
        for j in range(v1):
            p = i * v1 + j
            for ki in range(k):
                for kj in range(k):
                    q = (i + ki) * v + (j + kj)
                    w1_big = w1_big.at[q * c1:(q + 1) * c1,
                                       p * c2:(p + 1) * c2].set(w1_f[ki * k + kj])

    w2_f = (params["w2"] * params["s2"][None, None, :]).astype(f32).reshape(kk * c2, c3)
    w_out_f = (params["w_out"] * params["s_out"][None, :]).astype(f32)     # (c3, c4)

    b_in_big = jnp.tile(params["b_in"].astype(f32), (uv,)).reshape(1, uv * c1)
    b1_big = jnp.tile(params["b1"].astype(f32), (kk,)).reshape(1, kk * c2)
    b2 = params["b2"].astype(f32).reshape(1, c3)
    b_out = params["b_out"].astype(f32).reshape(1, c4)

    # ---- input layout: NCHW(+uv) -> (M, uv*c0), cast to bf16 ---------------
    x_cl = jnp.transpose(x, (0, 2, 3, 4, 5, 1)).reshape(M, uv * c0).astype(compute_dtype)
    w_in_big = w_in_big.astype(compute_dtype)
    w1_big = w1_big.astype(compute_dtype)
    w2_f = w2_f.astype(compute_dtype)
    w_out_f = w_out_f.astype(compute_dtype)

    # ---- VMEM-aware block pick + explicit vmem limit ------------------------
    itm = jnp.dtype(compute_dtype).itemsize
    lanes_in = _round_up(uv * c0, 128)
    lanes_y1 = _round_up(uv * c1, 128)
    lanes_y2 = _round_up(kk * c2, 128)
    lanes_y3 = _round_up(c3, 128)
    lanes_y4 = _round_up(c4, 128)
    row_bytes = (2 * lanes_in * itm                                   # dbl-buffered input
                 + (lanes_y1 + lanes_y2 + lanes_y3 + lanes_y4) * (4 + itm)  # f32 + bf16 acts
                 + 2 * lanes_y4 * 4)                                  # dbl-buffered output
    bm = _pick_block_m(M, row_bytes)
    grid = (M // bm,)

    w_bytes = 2 * itm * (w_in_big.size + w1_big.size + w2_f.size + w_out_f.size)
    b_bytes = 2 * 4 * 8 * (lanes_y1 + lanes_y2 + lanes_y3 + lanes_y4)
    vmem_limit = int(min(48 << 20, max(32 << 20,
                                       2 * (bm * row_bytes + w_bytes + b_bytes))))

    # ---- lane-dense output packing (only when (8,128)-legal) ----------------
    pack = 128 // c4 if (c4 < 128 and 128 % c4 == 0) else 1
    if pack > 1 and (bm % (8 * pack) != 0 or M % bm != 0):
        pack = 1
    out_rows, out_cols = M // pack, pack * c4

    out = pl.pallas_call(
        functools.partial(_sc_fused_kernel, pack=pack),
        out_shape=jax.ShapeDtypeStruct((out_rows, out_cols), jnp.float32),
        grid=grid,
        in_specs=[
            pl.BlockSpec((bm, uv * c0), lambda i: (i, 0)),
            pl.BlockSpec((uv * c0, uv * c1), lambda i: (0, 0)),
            pl.BlockSpec((1, uv * c1), lambda i: (0, 0)),
            pl.BlockSpec((uv * c1, kk * c2), lambda i: (0, 0)),
            pl.BlockSpec((1, kk * c2), lambda i: (0, 0)),
            pl.BlockSpec((kk * c2, c3), lambda i: (0, 0)),
            pl.BlockSpec((1, c3), lambda i: (0, 0)),
            pl.BlockSpec((c3, c4), lambda i: (0, 0)),
            pl.BlockSpec((1, c4), lambda i: (0, 0)),
        ],
        out_specs=pl.BlockSpec((bm // pack, out_cols), lambda i: (i, 0)),
        compiler_params=pltpu.CompilerParams(
            dimension_semantics=("parallel",),
            vmem_limit_bytes=vmem_limit),
    )(x_cl, w_in_big, b_in_big, w1_big, b1_big, w2_f, b2, w_out_f, b_out)

    # (M//pack, pack*c4) -> (M, c4) -> NCHW
    out = out.reshape(M, c4).reshape(b, h, w, c4)
    return jnp.transpose(out, (0, 3, 1, 2))


# ------------------------------------------------------------------
# Pure-JAX reference (correctness check, no Pallas)
# ------------------------------------------------------------------
def _conv3d_ref(y, w, scale, shift, relu, k=3):
    b, cin, D, U, V = y.shape
    cout = w.shape[2]
    uo, vo = U - k + 1, V - k + 1
    out = jnp.zeros((b, cout, D, uo, vo), jnp.float32)
    for ki in range(k):
        for kj in range(k):
            patch = y[:, :, :, ki:ki + uo, kj:kj + vo]
            out = out + jnp.einsum("bcdij,ce->bedij", patch, w[ki * k + kj])
    out = out * scale[None, :, None, None, None] + shift[None, :, None, None, None]
    if relu:
        out = jnp.maximum(out, 0.0)
    return out


def sc_reference(x, params, *, k=3):
    b, c0, h, w, u, v = x.shape
    x2 = x.reshape(b, c0, h * w, u * v)
    y = jnp.einsum("bcpq,cd->bdpq", x2, params["w_in"])
    y = y * params["s_in"][None, :, None, None] + params["b_in"][None, :, None, None]
    y = jnp.maximum(y, 0.0)
    c1 = y.shape[1]
    y = y.reshape(b, c1, h * w, u, v)
    y = _conv3d_ref(y, params["w1"], params["s1"], params["b1"], relu=True, k=k)
    y = _conv3d_ref(y, params["w2"], params["s2"], params["b2"], relu=True, k=k)
    c3 = y.shape[1]
    y = y.reshape(b, c3, h, w)
    z = jnp.einsum("bchw,cd->bdhw", y, params["w_out"])
    z = z * params["s_out"][None, :, None, None] + params["b_out"][None, :, None, None]
    return z


# ------------------------------------------------------------------
# Deterministic parameter init (synthetic; mirrors the module's shapes)
# ------------------------------------------------------------------
def init_params(key, planes, k=3):
    c0, c1, c2, c3, c4 = planes
    keys = jax.random.split(key, 20)
    eps = 1e-5

    def bn_fold(k_g, k_b, k_m, k_v, c):
        gamma = 1.0 + 0.1 * jax.random.normal(k_g, (c,), jnp.float32)
        beta = 0.05 * jax.random.normal(k_b, (c,), jnp.float32)
        mean = 0.01 * jax.random.normal(k_m, (c,), jnp.float32)
        var = 1.0 + 0.1 * jax.random.uniform(k_v, (c,), jnp.float32)
        scale = gamma / jnp.sqrt(var + eps)
        shift = beta - mean * scale
        return scale, shift

    params = {}
    # conv1x1_in: torch weight (c1, c0, 1, 1) -> stored as (c0, c1)
    params["w_in"] = 0.1 * jax.random.normal(keys[0], (c0, c1), jnp.float32)
    params["s_in"], params["b_in"] = bn_fold(keys[1], keys[2], keys[3], keys[4], c1)
    # conv1: torch weight (c2, c1, 1, k, k) -> stored as (k*k, c1, c2)
    params["w1"] = 0.1 * jax.random.normal(keys[5], (k * k, c1, c2), jnp.float32)
    params["s1"], params["b1"] = bn_fold(keys[6], keys[7], keys[8], keys[9], c2)
    # conv2
    params["w2"] = 0.1 * jax.random.normal(keys[10], (k * k, c2, c3), jnp.float32)
    params["s2"], params["b2"] = bn_fold(keys[11], keys[12], keys[13], keys[14], c3)
    # conv1x1_out: torch weight (c4, c3, 1, 1) -> stored as (c3, c4)
    params["w_out"] = 0.1 * jax.random.normal(keys[15], (c3, c4), jnp.float32)
    params["s_out"], params["b_out"] = bn_fold(keys[16], keys[17], keys[18], keys[19], c4)
    return params


if __name__ == "__main__":
    # Small shapes consistent with the module's forward:
    # do_padding=False, ksize=3 => u = v = 5 so the (u, v) dims collapse to 1x1.
    planes = (32, 16, 16, 16, 32)
    b, h, w, u, v = 2, 4, 4, 5, 5

    key = jax.random.PRNGKey(0)
    kx, kp = jax.random.split(key)
    x = jax.random.normal(kx, (b, planes[0], h, w, u, v), jnp.float32)
    params = init_params(kp, planes)

    out = jax.jit(sc_forward)(x, params)
    out = jax.block_until_ready(out)

    ref = sc_reference(x, params)
    assert out.shape == (b, planes[4], h, w), out.shape
    assert jnp.allclose(out, ref, atol=3e-2, rtol=3e-2), (
        float(jnp.max(jnp.abs(out - ref))))

    print("KERNEL_OK")
</pallas_src>

<mosaic_0001>
module attributes {stable_mosaic.version = 11 : i64} {
  func.func @_sc_fused_kernel(%arg0: i32, %arg1: memref<16x800xbf16, #tpu.memory_space<vmem>>, %arg2: memref<800x400xbf16, #tpu.memory_space<vmem>>, %arg3: memref<1x400xf32, #tpu.memory_space<vmem>>, %arg4: memref<400x144xbf16, #tpu.memory_space<vmem>>, %arg5: memref<1x144xf32, #tpu.memory_space<vmem>>, %arg6: memref<144x16xbf16, #tpu.memory_space<vmem>>, %arg7: memref<1x16xf32, #tpu.memory_space<vmem>>, %arg8: memref<16x32xbf16, #tpu.memory_space<vmem>>, %arg9: memref<1x32xf32, #tpu.memory_space<vmem>>, %arg10: memref<16x32xf32, #tpu.memory_space<vmem>>) attributes {dimension_semantics = [#tpu.dimension_semantics<parallel>], iteration_bounds = array<i64: 2>, scalar_prefetch = 0 : i64, scratch_operands = 0 : i64, tpu.core_type = #tpu.core_type<tc>, window_params = [{transform_indices = @transform_0, window_bounds = array<i64: 16, 800>}, {pipeline_mode = #tpu.pipeline_mode<synchronous>, transform_indices = @transform_1, window_bounds = array<i64: 800, 400>}, {pipeline_mode = #tpu.pipeline_mode<synchronous>, transform_indices = @transform_2, window_bounds = array<i64: 1, 400>}, {pipeline_mode = #tpu.pipeline_mode<synchronous>, transform_indices = @transform_3, window_bounds = array<i64: 400, 144>}, {pipeline_mode = #tpu.pipeline_mode<synchronous>, transform_indices = @transform_4, window_bounds = array<i64: 1, 144>}, {pipeline_mode = #tpu.pipeline_mode<synchronous>, transform_indices = @transform_5, window_bounds = array<i64: 144, 16>}, {pipeline_mode = #tpu.pipeline_mode<synchronous>, transform_indices = @transform_6, window_bounds = array<i64: 1, 16>}, {pipeline_mode = #tpu.pipeline_mode<synchronous>, transform_indices = @transform_7, window_bounds = array<i64: 16, 32>}, {pipeline_mode = #tpu.pipeline_mode<synchronous>, transform_indices = @transform_8, window_bounds = array<i64: 1, 32>}, {transform_indices = @transform_9, window_bounds = array<i64: 16, 32>}]} {
    %c0 = arith.constant 0 : index
    %c0_0 = arith.constant 0 : index
    %0 = vector.load %arg1[%c0, %c0_0] : memref<16x800xbf16, #tpu.memory_space<vmem>>, vector<16x800xbf16>
    %c0_1 = arith.constant 0 : index
    %c0_2 = arith.constant 0 : index
    %1 = vector.load %arg2[%c0_1, %c0_2] : memref<800x400xbf16, #tpu.memory_space<vmem>>, vector<800x400xbf16>
    %cst = arith.constant dense<0.000000e+00> : vector<16x400xf32>
    %2 = tpu.matmul %0, %1, %cst {dimension_numbers = #tpu.dot_dimension_numbers<[1], [0], [0], [1], [0, 0, 1, 1], [], []>} : vector<16x800xbf16>, vector<800x400xbf16>, vector<16x400xf32> -> vector<16x400xf32>
    %c0_3 = arith.constant 0 : index
    %c0_4 = arith.constant 0 : index
    %3 = vector.load %arg3[%c0_3, %c0_4] : memref<1x400xf32, #tpu.memory_space<vmem>>, vector<1x400xf32>
    %4 = vector.broadcast %3 : vector<1x400xf32> to vector<16x400xf32>
    %5 = arith.addf %2, %4 : vector<16x400xf32>
    %cst_5 = arith.constant 0.000000e+00 : f32
    %6 = vector.broadcast %cst_5 : f32 to vector<16x400xf32>
    %7 = arith.maximumf %5, %6 : vector<16x400xf32>
    %8 = arith.truncf %7 : vector<16x400xf32> to vector<16x400xbf16>
    %c0_6 = arith.constant 0 : index
    %c0_7 = arith.constant 0 : index
    %9 = vector.load %arg4[%c0_6, %c0_7] : memref<400x144xbf16, #tpu.memory_space<vmem>>, vector<400x144xbf16>
    %cst_8 = arith.constant dense<0.000000e+00> : vector<16x144xf32>
    %10 = tpu.matmul %8, %9, %cst_8 {dimension_numbers = #tpu.dot_dimension_numbers<[1], [0], [0], [1], [0, 0, 1, 1], [], []>} : vector<16x400xbf16>, vector<400x144xbf16>, vector<16x144xf32> -> vector<16x144xf32>
    %c0_9 = arith.constant 0 : index
    %c0_10 = arith.constant 0 : index
    %11 = vector.load %arg5[%c0_9, %c0_10] : memref<1x144xf32, #tpu.memory_space<vmem>>, vector<1x144xf32>
    %12 = vector.broadcast %11 : vector<1x144xf32> to vector<16x144xf32>
    %13 = arith.addf %10, %12 : vector<16x144xf32>
    %cst_11 = arith.constant 0.000000e+00 : f32
    %14 = vector.broadcast %cst_11 : f32 to vector<16x144xf32>
    %15 = arith.maximumf %13, %14 : vector<16x144xf32>
    %16 = arith.truncf %15 : vector<16x144xf32> to vector<16x144xbf16>
    %c0_12 = arith.constant 0 : index
    %c0_13 = arith.constant 0 : index
    %17 = vector.load %arg6[%c0_12, %c0_13] : memref<144x16xbf16, #tpu.memory_space<vmem>>, vector<144x16xbf16>
    %cst_14 = arith.constant dense<0.000000e+00> : vector<16x16xf32>
    %18 = tpu.matmul %16, %17, %cst_14 {dimension_numbers = #tpu.dot_dimension_numbers<[1], [0], [0], [1], [0, 0, 1, 1], [], []>} : vector<16x144xbf16>, vector<144x16xbf16>, vector<16x16xf32> -> vector<16x16xf32>
    %c0_15 = arith.constant 0 : index
    %c0_16 = arith.constant 0 : index
    %19 = vector.load %arg7[%c0_15, %c0_16] : memref<1x16xf32, #tpu.memory_space<vmem>>, vector<1x16xf32>
    %20 = vector.broadcast %19 : vector<1x16xf32> to vector<16x16xf32>
    %21 = arith.addf %18, %20 : vector<16x16xf32>
    %cst_17 = arith.constant 0.000000e+00 : f32
    %22 = vector.broadcast %cst_17 : f32 to vector<16x16xf32>
    %23 = arith.maximumf %21, %22 : vector<16x16xf32>
    %24 = arith.truncf %23 : vector<16x16xf32> to vector<16x16xbf16>
    %c0_18 = arith.constant 0 : index
    %c0_19 = arith.constant 0 : index
    %25 = vector.load %arg8[%c0_18, %c0_19] : memref<16x32xbf16, #tpu.memory_space<vmem>>, vector<16x32xbf16>
    %cst_20 = arith.constant dense<0.000000e+00> : vector<16x32xf32>
    %26 = tpu.matmul %24, %25, %cst_20 {dimension_numbers = #tpu.dot_dimension_numbers<[1], [0], [0], [1], [0, 0, 1, 1], [], []>} : vector<16x16xbf16>, vector<16x32xbf16>, vector<16x32xf32> -> vector<16x32xf32>
    %c0_21 = arith.constant 0 : index
    %c0_22 = arith.constant 0 : index
    %27 = vector.load %arg9[%c0_21, %c0_22] : memref<1x32xf32, #tpu.memory_space<vmem>>, vector<1x32xf32>
    %28 = vector.broadcast %27 : vector<1x32xf32> to vector<16x32xf32>
    %29 = arith.addf %26, %28 : vector<16x32xf32>
    %c0_23 = arith.constant 0 : index
    %c0_24 = arith.constant 0 : index
    %30 = vector.load %arg10[%c0_23, %c0_24] : memref<16x32xf32, #tpu.memory_space<vmem>>, vector<16x32xf32>
    tpu.vector_store %arg10[%c0_23, %c0_24], %29 {strides = array<i32>} : memref<16x32xf32, #tpu.memory_space<vmem>>, vector<16x32xf32>,
    return
  }
  func.func @transform_0(%arg0: i32) -> (i32, i32) {
    %c0_i32 = arith.constant 0 : i32
    %c0_i32_0 = arith.constant 0 : i32
    return %arg0, %c0_i32 : i32, i32
  }
  func.func @transform_1(%arg0: i32) -> (i32, i32) {
    %c0_i32 = arith.constant 0 : i32
    %c0_i32_0 = arith.constant 0 : i32
    %c0_i32_1 = arith.constant 0 : i32
    return %c0_i32, %c0_i32_0 : i32, i32
  }
  func.func @transform_2(%arg0: i32) -> (i32, i32) {
    %c0_i32 = arith.constant 0 : i32
    %c0_i32_0 = arith.constant 0 : i32
    %c0_i32_1 = arith.constant 0 : i32
    return %c0_i32, %c0_i32_0 : i32, i32
  }
  func.func @transform_3(%arg0: i32) -> (i32, i32) {
    %c0_i32 = arith.constant 0 : i32
    %c0_i32_0 = arith.constant 0 : i32
    %c0_i32_1 = arith.constant 0 : i32
    return %c0_i32, %c0_i32_0 : i32, i32
  }
  func.func @transform_4(%arg0: i32) -> (i32, i32) {
    %c0_i32 = arith.constant 0 : i32
    %c0_i32_0 = arith.constant 0 : i32
    %c0_i32_1 = arith.constant 0 : i32
    return %c0_i32, %c0_i32_0 : i32, i32
  }
  func.func @transform_5(%arg0: i32) -> (i32, i32) {
    %c0_i32 = arith.constant 0 : i32
    %c0_i32_0 = arith.constant 0 : i32
    %c0_i32_1 = arith.constant 0 : i32
    return %c0_i32, %c0_i32_0 : i32, i32
  }
  func.func @transform_6(%arg0: i32) -> (i32, i32) {
    %c0_i32 = arith.constant 0 : i32
    %c0_i32_0 = arith.constant 0 : i32
    %c0_i32_1 = arith.constant 0 : i32
    return %c0_i32, %c0_i32_0 : i32, i32
  }
  func.func @transform_7(%arg0: i32) -> (i32, i32) {
    %c0_i32 = arith.constant 0 : i32
    %c0_i32_0 = arith.constant 0 : i32
    %c0_i32_1 = arith.constant 0 : i32
    return %c0_i32, %c0_i32_0 : i32, i32
  }
  func.func @transform_8(%arg0: i32) -> (i32, i32) {
    %c0_i32 = arith.constant 0 : i32
    %c0_i32_0 = arith.constant 0 : i32
    %c0_i32_1 = arith.constant 0 : i32
    return %c0_i32, %c0_i32_0 : i32, i32
  }
  func.func @transform_9(%arg0: i32) -> (i32, i32) {
    %c0_i32 = arith.constant 0 : i32
    %c0_i32_0 = arith.constant 0 : i32
    return %arg0, %c0_i32 : i32, i32
  }
}

</mosaic_0001>

<bundles_post_ra>
// kernel: tile.13
= control target key start
LH: loop header
LB: loop body
LE: loop exit
PB: predicated region body
PF: predicated region fallthrough
CT: control target
= control target key end

     0   :  { %s40_s0 = inlined_call_operand.vmem [shape: f32[16], index: 0, kind: input, shape index: {}]   ;;  %s41_s1 = inlined_call_operand.vmem [shape: f32[25,16], index: 1, kind: output, shape index: {}]  }
   0x1   :  { %v4_v0 = vld [vmem:[%s40_s0] ss:$0 sm:$0xff] }
   0x2   :  { %5 = vst [vmem:[%s41_s1] sm:$0xff] %v4_v0  ;;  %12 = vst [vmem:[%s41_s1 + $0x8] sm:$0xff] %v4_v0 }
   0x3   :  { %13 = vst [vmem:[%s41_s1 + $0x10] sm:$0xff] %v4_v0  ;;  %14 = vst [vmem:[%s41_s1 + $0x18] sm:$0xff] %v4_v0 }

// kernel: tile.14
= control target key start
LH: loop header
LB: loop body
LE: loop exit
PB: predicated region body
PF: predicated region fallthrough
CT: control target
= control target key end

     0   :  { %s89_s8 = smov 112   ;;  %s90_s11 = smov 80   ;;  %vm3_vm0 = vcmask 130048   ;;  %vm9_vm1 = vcmask 1048448   ;;  %vm15_vm2 = vcmask 917248   ;;  %vm21_vm3 = vcmask 786048   ;;  %s142_s0 = inlined_call_operand.vmem [shape: f32[25,16], index: 0, kind: input, shape index: {}]   ;;  %s143_s1 = inlined_call_operand.vmem [shape: f32[1,400], index: 1, kind: output, shape index: {}]  }
   0x1   :  { %v72_v0 = vld [vmem:[%s142_s0 + $0x7] ss:$8 sm:$0x7]   ;;  %v74_v1 = vld [vmem:[%s142_s0 + $0x5] ss:$8 sm:$0x7]  }
   0x2   :  { %7 = vrot.lane.b32.xlu0 %v72_v0, %s89_s8  ;;  %19 = vrot.lane.b32.xlu1 %v74_v1, %s90_s11  ;;  %v73_v2 = vld [vmem:[%s142_s0 + $0x6] ss:$8 sm:$0x7]   ;;  %v75_v3 = vld [vmem:[%s142_s0 + $0x4] ss:$8 sm:$0x7]  }
   0x3   :  { %s91_s16 = smov 96   ;;  %v2_v4 = vld [vmem:[%s142_s0] ss:$8 sm:$0xf]   ;;  %s92_s19 = smov 64   ;;  %vm27_vm4 = vcmask 654848  }
   0x4   :  { %v76_v5 = vld [vmem:[%s142_s0 + $0x3] ss:$8 sm:$0x7]   ;;  %4 = vst.msk [vmem:[#allocation0] ss:$8 sm:$0xf] %vm3_vm0, %v2_v4  }
   0x5   :  { %v77_v6 = vld [vmem:[%s142_s0 + $0x2] ss:$8 sm:$0x7]   ;;  %s93_s24 = smov 48   ;;  %s94_s25 = smov 32   ;;  %vm33_vm5 = vcmask 523648  }
   0x6   :  { %13 = vrot.lane.b32.xlu0 %v73_v2, %s91_s16  ;;  %25 = vrot.lane.b32.xlu1 %v75_v3, %s92_s19  ;;  %v78_v7 = vld [vmem:[%s142_s0 + $0x1] ss:$8 sm:$0x7]   ;;  %s95_s0 = smov 16   ;;  %vm39_vm6 = vcmask 392448   ;;  %vm45_vm7 = vcmask 261248  }
   0xa   :  { %31 = vrot.lane.b32.xlu0 %v76_v5, %s93_s24  ;;  %37 = vrot.lane.b32.xlu1 %v77_v6, %s94_s25 }
   0xb   :  { %v65_v8 = vld [vmem:[#allocation0 + $0x18] sm:$0x1] }
   0xc   :  { %81 = vst [vmem:[%s143_s1 + $0x3] sm:$0x1] %v65_v8 }
   0xe   :  { %43 = vrot.lane.b32.xlu0 %v78_v7, %s95_s0 }
  0x74   :  { %v8_v9 = vpop.permute.xlu0 %7   ;;  %v20_v10 = vpop.permute.xlu1 %19  }
  0x75   :  { %10 = vst.msk [vmem:[#allocation0] ss:$8 sm:$0x7] %vm9_vm1, %v8_v9  }
  0x78   :  { %v14_v11 = vpop.permute.xlu0 %13   ;;  %v26_v12 = vpop.permute.xlu1 %25  }
  0x79   :  { %16 = vst.msk [vmem:[#allocation0] ss:$8 sm:$0x7] %vm15_vm2, %v14_v11  }
  0x7a   :  { %22 = vst.msk [vmem:[#allocation0] ss:$8 sm:$0x7] %vm21_vm3, %v20_v10  }
  0x7b   :  { %28 = vst.msk [vmem:[#allocation0] ss:$8 sm:$0x7] %vm27_vm4, %v26_v12  }
  0x7c   :  { %v32_v13 = vpop.permute.xlu0 %31   ;;  %v38_v14 = vpop.permute.xlu1 %37  }
  0x7d   :  { %34 = vst.msk [vmem:[#allocation0] ss:$8 sm:$0x7] %vm33_vm5, %v32_v13  }
  0x7e   :  { %40 = vst.msk [vmem:[#allocation0] ss:$8 sm:$0x7] %vm39_vm6, %v38_v14  }
  0x80   :  { %v44_v15 = vpop.permute.xlu0 %43  }
  0x81   :  { %46 = vst.msk [vmem:[#allocation0] ss:$8 sm:$0x7] %vm45_vm7, %v44_v15  }
  0x88   :  { %v50_v16 = vld [vmem:[#allocation0] sm:$0x1]  ;;  %v54_v17 = vld [vmem:[#allocation0 + $0x8] sm:$0x1]  ;;  %v59_v18 = vld [vmem:[#allocation0 + $0x10] sm:$0x1] }
  0x89   :  { %52 = vst [vmem:[%s143_s1] sm:$0x1] %v50_v16  ;;  %79 = vst [vmem:[%s143_s1 + $0x1] sm:$0x1] %v54_v17 }
  0x8a   :  { %80 = vst [vmem:[%s143_s1 + $0x2] sm:$0x1] %v59_v18 }

// kernel: tile.18
= control target key start
LH: loop header
LB: loop body
LE: loop exit
PB: predicated region body
PF: predicated region fallthrough
CT: control target
= control target key end

     0   :  { %s28_s0 = inlined_call_operand.vmem [shape: f32[16], index: 0, kind: input, shape index: {}]   ;;  %s29_s1 = inlined_call_operand.vmem [shape: f32[9,16], index: 1, kind: output, shape index: {}]  }
   0x1   :  { %v4_v0 = vld [vmem:[%s28_s0] ss:$0 sm:$0xff] }
   0x2   :  { %5 = vst [vmem:[%s29_s1] sm:$0xff] %v4_v0  ;;  %8 = vst [vmem:[%s29_s1 + $0x8] sm:$0xff] %v4_v0 }

// kernel: tile.19
= control target key start
LH: loop header
LB: loop body
LE: loop exit
PB: predicated region body
PF: predicated region fallthrough
CT: control target
= control target key end

     0   :  { %s74_s10 = smov 112   ;;  %s75_s11 = smov 80   ;;  %vm4_vm0 = vcmask 130048   ;;  %vm10_vm1 = vcmask 1048448   ;;  %vm16_vm2 = vcmask 917248   ;;  %vm22_vm3 = vcmask 786048   ;;  %s121_s0 = inlined_call_operand.vmem [shape: f32[9,16], index: 0, kind: input, shape index: {}]   ;;  %s122_s1 = inlined_call_operand.vmem [shape: f32[1,144], index: 1, kind: output, shape index: {}]  }
   0x1   :  { %v59_v0 = vld [vmem:[%s121_s0 + $0x7] sm:$0x1]   ;;  %v61_v1 = vld [vmem:[%s121_s0 + $0x5] sm:$0x1]   ;;  %v60_v2 = vld [vmem:[%s121_s0 + $0x6] sm:$0x1]  }
   0x2   :  { %8 = vrot.lane.b32.xlu0 %v59_v0, %s74_s10  ;;  %20 = vrot.lane.b32.xlu1 %v61_v1, %s75_s11  ;;  %v62_v3 = vld [vmem:[%s121_s0 + $0x4] sm:$0x1]   ;;  %s2_s16 = smov 3  ;;  %s76_s19 = smov 96   ;;  %v63_v5 = vld [vmem:[%s121_s0 + $0x3] sm:$0x1]  }
   0x3   :  { %v3_v4 = vld [vmem:[%s121_s0] ss:$8 sm:%s2_s16]   ;;  %s77_s20 = smov 64   ;;  %v64_v6 = vld [vmem:[%s121_s0 + $0x2] sm:$0x1]   ;;  %s78_s25 = smov 48  }
   0x4   :  { %5 = vst.msk [vmem:[#allocation0] ss:$8 sm:$0x3] %vm4_vm0, %v3_v4   ;;  %s79_s26 = smov 32   ;;  %v65_v7 = vld [vmem:[%s121_s0 + $0x1] sm:$0x1]  }
   0x5   :  { %s80_s0 = smov 16   ;;  %vm28_vm4 = vcmask 654848   ;;  %vm34_vm5 = vcmask 523648   ;;  %vm40_vm6 = vcmask 392448   ;;  %vm46_vm7 = vcmask 261248  }
   0x6   :  { %14 = vrot.lane.b32.xlu0 %v60_v2, %s76_s19  ;;  %26 = vrot.lane.b32.xlu1 %v62_v3, %s77_s20 }
   0xa   :  { %32 = vrot.lane.b32.xlu0 %v63_v5, %s78_s25  ;;  %38 = vrot.lane.b32.xlu1 %v64_v6, %s79_s26 }
   0xb   :  { %v55_v8 = vld [vmem:[#allocation0 + $0x8] sm:$0x1] }
   0xc   :  { %66 = vst [vmem:[%s122_s1 + $0x1] sm:$0x1] %v55_v8 }
   0xe   :  { %44 = vrot.lane.b32.xlu0 %v65_v7, %s80_s0 }
  0x74   :  { %v9_v9 = vpop.permute.xlu0 %8   ;;  %v21_v10 = vpop.permute.xlu1 %20  }
  0x75   :  { %11 = vst.msk [vmem:[#allocation0] sm:$0x1] %vm10_vm1, %v9_v9  }
  0x78   :  { %v15_v11 = vpop.permute.xlu0 %14   ;;  %v27_v12 = vpop.permute.xlu1 %26  }
  0x79   :  { %17 = vst.msk [vmem:[#allocation0] sm:$0x1] %vm16_vm2, %v15_v11  }
  0x7a   :  { %23 = vst.msk [vmem:[#allocation0] sm:$0x1] %vm22_vm3, %v21_v10  }
  0x7b   :  { %29 = vst.msk [vmem:[#allocation0] sm:$0x1] %vm28_vm4, %v27_v12  }
  0x7c   :  { %v33_v13 = vpop.permute.xlu0 %32   ;;  %v39_v14 = vpop.permute.xlu1 %38  }
  0x7d   :  { %35 = vst.msk [vmem:[#allocation0] sm:$0x1] %vm34_vm5, %v33_v13  }
  0x7e   :  { %41 = vst.msk [vmem:[#allocation0] sm:$0x1] %vm40_vm6, %v39_v14  }
  0x80   :  { %v45_v15 = vpop.permute.xlu0 %44  }
  0x81   :  { %47 = vst.msk [vmem:[#allocation0] sm:$0x1] %vm46_vm7, %v45_v15  }
  0x88   :  { %v51_v16 = vld [vmem:[#allocation0] sm:$0x1] }
  0x89   :  { %53 = vst [vmem:[%s122_s1] sm:$0x1] %v51_v16 }

// kernel: sc_forward.1
= control target key start
LH: loop header
LB: loop body
LE: loop exit
PB: predicated region body
PF: predicated region fallthrough
CT: control target
= control target key end

     0   :  { %14 = vsyncpa [#allocation3], 0  ;;  %s4464_s0 = inlined_call_operand.vmem [shape: bf16[32,800], index: 0, kind: input, shape index: {}]   ;;  %s4465_s1 = inlined_call_operand.vmem [shape: bf16[800,400], index: 1, kind: input, shape index: {}]   ;;  %s4466_s2 = inlined_call_operand.vmem [shape: f32[1,400], index: 2, kind: input, shape index: {}]   ;;  %s4467_s3 = inlined_call_operand.vmem [shape: bf16[400,144], index: 3, kind: input, shape index: {}]   ;;  %s4468_s4 = inlined_call_operand.vmem [shape: f32[1,144], index: 4, kind: input, shape index: {}]   ;;  %s4469_s5 = inlined_call_operand.vmem [shape: bf16[144,16], index: 5, kind: input, shape index: {}]   ;;  %s4470_s6 = inlined_call_operand.vmem [shape: f32[1,16], index: 6, kind: input, shape index: {}]   ;;  %s4471_s7 = inlined_call_operand.vmem [shape: bf16[16,32], index: 7, kind: input, shape index: {}]   ;;  %s4472_s8 = inlined_call_operand.vmem [shape: f32[1,32], index: 8, kind: input, shape index: {}]   ;;  %s4473_s9 = inlined_call_operand.hbm [shape: f32[32,32], index: 9, kind: output, shape index: {}]  }
   0x1   :  { %16 = vsyncpa [#allocation3 + $0x1], 0  ;;  %s3529_s30 = smov 0   ;;  %s3531_s10 = smov 0  }
   0x2   :  { %s3533_s11 = smov 0   ;;  %s3535_s12 = smov 0  }
   0x3 LB: > { %s3550_s13 = sadd.s32 4294967295, %s3471_s12   ;;  %s2634_s14 = sadd.s32 4294967294, %s3471_s12   ;;  %s3471_s12 = sphi %s3535_s12, %s4479_s12   ;;  %s3467_s11 = sphi %s3533_s11, %s4478_s11   ;;  %s3463_s10 = sphi %s3531_s10, %s4477_s10   ;;  %s3459_s30 = sphi %s3529_s30, %s4476_s30  }
   0x4   : > { %s3554_s15 = sadd.s32 1, %s3471_s12   ;;  %s223_s16 = sadd.s32 1, %s3467_s11 }
   0x5   : > { %s220_s17 = ssub.s32 %s3471_s12, %s3554_s15  ;;  %p233_p0 = scmp.ne.s32.totalorder %s3467_s11, %s3463_s10 }
   0x6   : > { %p221_p1 = scmp.eq.s32.totalorder %s220_s17, 0  ;;  %p234_p2 = scmp.eq.s32.totalorder %s3550_s13, 1 }
   0x7   : > { %p239_p3 = scmp.ne.s32.totalorder %s3463_s10, %s3459_s30  ;;  %p240_p4 = scmp.eq.s32.totalorder %s2634_s14, 1 }
   0x8   : > { %s3565_s18 = scalar_select %p221_p1, %s3467_s11, %s223_s16  }
   0x9   : > { %p3567_p5 = por %p234_p2, %p233_p0  ;;  %p3571_p6 = por %p240_p4, %p239_p3 }
   0xa   : > { %p2637_p7 = scmp.ge.s32.totalorder %s3471_s12, 1  ;;  %p292_p8 = scmp.lt.s32.totalorder %s3471_s12, 3 }
   0xc   : > { %p293_p9 = pnand %p2637_p7, %p292_p8 }
   0xd   : > { %v3014_v0 = vld [vmem:[%s4465_s1 + $0x4] ss:$16 sps:$4 sm:$0xff] (!%p293_p9)   ;;  %v3016_v1 = vld [vmem:[%s4465_s1 + $0xc] ss:$16 sps:$4 sm:$0xff] (!%p293_p9)   ;;  %v3018_v2 = vld [vmem:[%s4465_s1] ss:$16 sps:$4 sm:$0xff] (!%p293_p9)  }
   0xe   : > { %296 = sbr.rel (%p293_p9) target bundleno = 1121 (0x461), region = 56  ;;  %1607 = vmatprep.subr.bf16.mxu0 (!%p293_p9), %v3014_v0  ;;  %v3019_v3 = vld [vmem:[%s4465_s1 + $0x8] ss:$16 sps:$4 sm:$0xff] (!%p293_p9)   ;;  %1779 = vmatprep.subr.bf16.mxu1 (!%p293_p9), %v3016_v1  ;;  %v3020_v4 = vld [vmem:[%s4465_s1 + $0x24] ss:$16 sps:$4 sm:$0xff] (!%p293_p9)   ;;  %s2639_s21 = sshll.u32 (!%p293_p9), %s3550_s13, 1 }
   0xf   : > { %1608 = vmatpush1.bf16.msra.mxu0 (!%p293_p9), %v3018_v2  ;;  %1780 = vmatpush1.bf16.msra.mxu1 (!%p293_p9), %v3019_v3  ;;  %v3022_v5 = vld [vmem:[%s4465_s1 + $0x2c] ss:$16 sps:$4 sm:$0xff] (!%p293_p9)   ;;  %v3024_v6 = vld [vmem:[%s4465_s1 + $0x20] ss:$16 sps:$4 sm:$0xff] (!%p293_p9)   ;;  %v3025_v7 = vld [vmem:[%s4465_s1 + $0x28] ss:$16 sps:$4 sm:$0xff] (!%p293_p9)  }
  0x10   : > { %1609 = vmatprep.subr.bf16.mxu0 (!%p293_p9), %v3020_v4  ;;  %1781 = vmatprep.subr.bf16.mxu1 (!%p293_p9), %v3022_v5  ;;  %v3026_v8 = vld [vmem:[%s4465_s1 + $0x44] ss:$16 sps:$4 sm:$0xff] (!%p293_p9)   ;;  %v3028_v9 = vld [vmem:[%s4465_s1 + $0x4c] ss:$16 sps:$4 sm:$0xff] (!%p293_p9)   ;;  %v3030_v10 = vld [vmem:[%s4465_s1 + $0x40] ss:$16 sps:$4 sm:$0xff] (!%p293_p9)  }
  0x11   : > { %v3031_v11 = vld [vmem:[%s4465_s1 + $0x48] ss:$16 sps:$4 sm:$0xff] (!%p293_p9)   ;;  %v3032_v12 = vld [vmem:[%s4465_s1 + $0x64] ss:$16 sps:$4 sm:$0xff] (!%p293_p9)   ;;  %v3034_v13 = vld [vmem:[%s4465_s1 + $0x6c] ss:$16 sps:$4 sm:$0xff] (!%p293_p9)  }
  0x12   : > { %v3036_v14 = vld [vmem:[%s4465_s1 + $0x60] ss:$16 sps:$4 sm:$0xff] (!%p293_p9)   ;;  %v3037_v15 = vld [vmem:[%s4465_s1 + $0x68] ss:$16 sps:$4 sm:$0xff] (!%p293_p9)   ;;  %v3038_v16 = vld [vmem:[%s4465_s1 + $0x84] ss:$16 sps:$4 sm:$0xff] (!%p293_p9)  }
  0x13   : > { %1610 = vmatpush1.bf16.msra.mxu0 (!%p293_p9), %v3024_v6  ;;  %1782 = vmatpush1.bf16.msra.mxu1 (!%p293_p9), %v3025_v7  ;;  %v3040_v17 = vld [vmem:[%s4465_s1 + $0x8c] ss:$16 sps:$4 sm:$0xff] (!%p293_p9)   ;;  %v3042_v18 = vld [vmem:[%s4465_s1 + $0x80] ss:$16 sps:$4 sm:$0xff] (!%p293_p9)   ;;  %v3043_v19 = vld [vmem:[%s4465_s1 + $0x88] ss:$16 sps:$4 sm:$0xff] (!%p293_p9)  }
  0x14   : > { %1611 = vmatprep.subr.bf16.mxu0 (!%p293_p9), %v3026_v8  ;;  %1783 = vmatprep.subr.bf16.mxu1 (!%p293_p9), %v3028_v9  ;;  %v3044_v20 = vld [vmem:[%s4465_s1 + $0xa4] ss:$16 sps:$4 sm:$0xff] (!%p293_p9)   ;;  %v3046_v21 = vld [vmem:[%s4465_s1 + $0xac] ss:$16 sps:$4 sm:$0xff] (!%p293_p9)   ;;  %v3048_v22 = vld [vmem:[%s4465_s1 + $0xa0] ss:$16 sps:$4 sm:$0xff] (!%p293_p9)  }
  0x15   : > { %v3049_v23 = vld [vmem:[%s4465_s1 + $0xa8] ss:$16 sps:$4 sm:$0xff]   ;;  %v3050_v24 = vld [vmem:[%s4465_s1 + $0xc4] ss:$16 sps:$4 sm:$0xff]   ;;  %v3052_v25 = vld [vmem:[%s4465_s1 + $0xcc] ss:$16 sps:$4 sm:$0xff]  }
  0x16   : > { %v3054_v26 = vld [vmem:[%s4465_s1 + $0xc0] ss:$16 sps:$4 sm:$0xff]   ;;  %v3055_v27 = vld [vmem:[%s4465_s1 + $0xc8] ss:$16 sps:$4 sm:$0xff]   ;;  %v3056_v28 = vld [vmem:[%s4465_s1 + $0xe4] ss:$16 sps:$4 sm:$0xff]  }
  0x17   : > { %1612 = vmatpush1.bf16.msra.mxu0 %v3030_v10  ;;  %1784 = vmatpush1.bf16.msra.mxu1 %v3031_v11  ;;  %v3058_v29 = vld [vmem:[%s4465_s1 + $0xec] ss:$16 sps:$4 sm:$0xff]   ;;  %v3060_v30 = vld [vmem:[%s4465_s1 + $0xe0] ss:$16 sps:$4 sm:$0xff]   ;;  %v3061_v31 = vld [vmem:[%s4465_s1 + $0xe8] ss:$16 sps:$4 sm:$0xff]  }
  0x18   : > { %1613 = vmatprep.subr.bf16.mxu0 %v3032_v12  ;;  %1785 = vmatprep.subr.bf16.mxu1 %v3034_v13  ;;  %v3062_v32 = vld [vmem:[%s4465_s1 + $0x104] ss:$16 sps:$4 sm:$0xff]   ;;  %p330_p10 = scmp.lt.s32.totalorder %s2639_s21, 3  ;;  %v3064_v33 = vld [vmem:[%s4465_s1 + $0x10c] ss:$16 sps:$4 sm:$0xff]   ;;  %vm1603_vm0 = vcmask 261120  }
  0x19   : > { %v3066_v34 = vld [vmem:[%s4465_s1 + $0x100] ss:$16 sps:$4 sm:$0xff]   ;;  %v3067_v35 = vld [vmem:[%s4465_s1 + $0x108] ss:$16 sps:$4 sm:$0xff]   ;;  %v3068_v36 = vld [vmem:[%s4465_s1 + $0x124] ss:$16 sps:$4 sm:$0xff]  }
  0x1a   : > { %s4481_s21 = smov (!%p330_p10, %s2639_s21), 3  ;;  %v3070_v37 = vld [vmem:[%s4465_s1 + $0x12c] ss:$16 sps:$4 sm:$0xff]   ;;  %v3072_v38 = vld [vmem:[%s4465_s1 + $0x120] ss:$16 sps:$4 sm:$0xff]   ;;  %vm2275_vm1 = vcmask 130048  }
  0x1b   : > { %1614 = vmatpush1.bf16.msra.mxu0 %v3036_v14  ;;  %1786 = vmatpush1.bf16.msra.mxu1 %v3037_v15  ;;  %v3073_v39 = vld [vmem:[%s4465_s1 + $0x128] ss:$16 sps:$4 sm:$0xff]   ;;  %v3074_v40 = vld [vmem:[%s4465_s1 + $0x144] ss:$16 sps:$4 sm:$0xff]   ;;  %s2969_s22 = smul.u32 28, %s4481_s21  ;;  %vm3475_vm2 = vmmov 0  }
  0x1c   : > { %1615 = vmatprep.subr.bf16.mxu0 %v3038_v16  ;;  %1787 = vmatprep.subr.bf16.mxu1 %v3040_v17  ;;  %v3076_v41 = vld [vmem:[%s4465_s1 + $0x14c] ss:$16 sps:$4 sm:$0xff]   ;;  %v3078_v42 = vld [vmem:[%s4465_s1 + $0x140] ss:$16 sps:$4 sm:$0xff]   ;;  %v3079_v43 = vld [vmem:[%s4465_s1 + $0x148] ss:$16 sps:$4 sm:$0xff]  }
  0x1d   : > { %v3080_v44 = vld [vmem:[%s4465_s1 + $0x164] ss:$16 sps:$4 sm:$0xff]   ;;  %s3716_s17 = scalar_lea.vmem %s4464_s0, %s2969_s22  ;;  %v3082_v45 = vld [vmem:[%s4465_s1 + $0x16c] ss:$16 sps:$4 sm:$0xff]   ;;  %v3084_v46 = vld [vmem:[%s4465_s1 + $0x160] ss:$16 sps:$4 sm:$0xff]  }
  0x1e   : > { %v3085_v47 = vld [vmem:[%s4465_s1 + $0x168] ss:$16 sps:$4 sm:$0xff]   ;;  %v3112_v48 = vld [vmem:[%s3716_s17 + $0x4] ss:$28 sps:$4 sm:$0xff]   ;;  %v3088_v50 = vld [vmem:[%s4465_s1 + $0x18c] ss:$16 sps:$4 sm:$0xff]  }
  0x1f   : > { %1616 = vmatpush1.bf16.msra.mxu0 %v3042_v18  ;;  %1788 = vmatpush1.bf16.msra.mxu1 %v3043_v19  ;;  %v3086_v49 = vld [vmem:[%s4465_s1 + $0x184] ss:$16 sps:$4 sm:$0xff]   ;;  %v3090_v51 = vld [vmem:[%s4465_s1 + $0x180] ss:$16 sps:$4 sm:$0xff]   ;;  %v3091_v52 = vld [vmem:[%s4465_s1 + $0x188] ss:$16 sps:$4 sm:$0xff]  }
  0x20   : > { %1617 = vmatprep.subr.bf16.mxu0 %v3044_v20  ;;  %1789 = vmatprep.subr.bf16.mxu1 %v3046_v21  ;;  %v3092_v53 = vld [vmem:[%s4465_s1 + $0x1a4] ss:$16 sps:$4 sm:$0xff]   ;;  %v3094_v54 = vld [vmem:[%s4465_s1 + $0x1ac] ss:$16 sps:$4 sm:$0xff]   ;;  %v3096_v55 = vld [vmem:[%s4465_s1 + $0x1a0] ss:$16 sps:$4 sm:$0xff]  }
  0x21   : > { %1639 = vmatprep.mubr.bf16.mxu0 %v3112_v48  ;;  %1811 = vmatprep.mubr.bf16.mxu1 %v3112_v48  ;;  %v3097_v56 = vld [vmem:[%s4465_s1 + $0x1a8] ss:$16 sps:$4 sm:$0xff]   ;;  %v3098_v57 = vld [vmem:[%s4465_s1 + $0x1c4] ss:$16 sps:$4 sm:$0xff]   ;;  %v3100_v58 = vld [vmem:[%s4465_s1 + $0x1cc] ss:$16 sps:$4 sm:$0xff]  }
  0x22   : > { %v3102_v59 = vld [vmem:[%s4465_s1 + $0x1c0] ss:$16 sps:$4 sm:$0xff]   ;;  %v3103_v60 = vld [vmem:[%s4465_s1 + $0x1c8] ss:$16 sps:$4 sm:$0xff]   ;;  %v3104_v61 = vld [vmem:[%s4465_s1 + $0x1e4] ss:$16 sps:$4 sm:$0xff]  }
  0x23   : > { %1618 = vmatpush1.bf16.msra.mxu0 %v3048_v22  ;;  %1790 = vmatpush1.bf16.msra.mxu1 %v3049_v23  ;;  %v3106_v62 = vld [vmem:[%s4465_s1 + $0x1ec] ss:$16 sps:$4 sm:$0xff]   ;;  %v3108_v63 = vld [vmem:[%s4465_s1 + $0x1e0] ss:$16 sps:$4 sm:$0xff]   ;;  %v3109_v0 = vld [vmem:[%s4465_s1 + $0x1e8] ss:$16 sps:$4 sm:$0xff]  }
  0x24   : > { %1619 = vmatprep.subr.bf16.mxu0 %v3050_v24  ;;  %1791 = vmatprep.subr.bf16.mxu1 %v3052_v25  ;;  %v3115_v1 = vld [vmem:[%s4465_s1 + $0x204] ss:$16 sps:$4 sm:$0xff]   ;;  %v3118_v2 = vld [vmem:[%s4465_s1 + $0x20c] ss:$16 sps:$4 sm:$0xff]   ;;  %v3113_v4 = vld [vmem:[%s4465_s1 + $0x200] ss:$16 sps:$4 sm:$0xff]  }
  0x25   : > { %v3110_v3 = vld [vmem:[%s3716_s17] ss:$28 sps:$4 sm:$0xff]   ;;  %v3116_v5 = vld [vmem:[%s4465_s1 + $0x208] ss:$16 sps:$4 sm:$0xff]   ;;  %v3121_v6 = vld [vmem:[%s4465_s1 + $0x224] ss:$16 sps:$4 sm:$0xff]  }
  0x26   : > { %v3124_v7 = vld [vmem:[%s4465_s1 + $0x22c] ss:$16 sps:$4 sm:$0xff]   ;;  %v3119_v8 = vld [vmem:[%s4465_s1 + $0x220] ss:$16 sps:$4 sm:$0xff]   ;;  %v3122_v9 = vld [vmem:[%s4465_s1 + $0x228] ss:$16 sps:$4 sm:$0xff]  }
  0x27   : > { %1620 = vmatpush1.bf16.msra.mxu0 %v3054_v26  ;;  %1792 = vmatpush1.bf16.msra.mxu1 %v3055_v27  ;;  %v3127_v10 = vld [vmem:[%s4465_s1 + $0x244] ss:$16 sps:$4 sm:$0xff]   ;;  %v3130_v11 = vld [vmem:[%s4465_s1 + $0x24c] ss:$16 sps:$4 sm:$0xff]   ;;  %v3125_v12 = vld [vmem:[%s4465_s1 + $0x240] ss:$16 sps:$4 sm:$0xff]  }
  0x28   : > { %1621 = vmatprep.subr.bf16.mxu0 %v3056_v28  ;;  %1793 = vmatprep.subr.bf16.mxu1 %v3058_v29  ;;  %v3128_v13 = vld [vmem:[%s4465_s1 + $0x248] ss:$16 sps:$4 sm:$0xff]   ;;  %v3133_v14 = vld [vmem:[%s4465_s1 + $0x264] ss:$16 sps:$4 sm:$0xff]   ;;  %v3136_v15 = vld [vmem:[%s4465_s1 + $0x26c] ss:$16 sps:$4 sm:$0xff]  }
  0x29   : > { %v3131_v16 = vld [vmem:[%s4465_s1 + $0x260] ss:$16 sps:$4 sm:$0xff]   ;;  %v3134_v17 = vld [vmem:[%s4465_s1 + $0x268] ss:$16 sps:$4 sm:$0xff]   ;;  %v3139_v18 = vld [vmem:[%s4465_s1 + $0x284] ss:$16 sps:$4 sm:$0xff]  }
  0x2a   : > { %v3142_v19 = vld [vmem:[%s4465_s1 + $0x28c] ss:$16 sps:$4 sm:$0xff]   ;;  %v3137_v20 = vld [vmem:[%s4465_s1 + $0x280] ss:$16 sps:$4 sm:$0xff]   ;;  %v3140_v21 = vld [vmem:[%s4465_s1 + $0x288] ss:$16 sps:$4 sm:$0xff]  }
  0x2b   : > { %1622 = vmatpush1.bf16.msra.mxu0 %v3060_v30  ;;  %1794 = vmatpush1.bf16.msra.mxu1 %v3061_v31  ;;  %v3145_v22 = vld [vmem:[%s4465_s1 + $0x2a4] ss:$16 sps:$4 sm:$0xff]   ;;  %v3148_v23 = vld [vmem:[%s4465_s1 + $0x2ac] ss:$16 sps:$4 sm:$0xff]   ;;  %v3143_v24 = vld [vmem:[%s4465_s1 + $0x2a0] ss:$16 sps:$4 sm:$0xff]  }
  0x2c   : > { %1623 = vmatprep.subr.bf16.mxu0 %v3062_v32  ;;  %1795 = vmatprep.subr.bf16.mxu1 %v3064_v33  ;;  %v3146_v25 = vld [vmem:[%s4465_s1 + $0x2a8] ss:$16 sps:$4 sm:$0xff]   ;;  %v3151_v26 = vld [vmem:[%s4465_s1 + $0x2c4] ss:$16 sps:$4 sm:$0xff]   ;;  %v3154_v27 = vld [vmem:[%s4465_s1 + $0x2cc] ss:$16 sps:$4 sm:$0xff]  }
  0x2d   : > { %v3149_v28 = vld [vmem:[%s4465_s1 + $0x2c0] ss:$16 sps:$4 sm:$0xff]   ;;  %v3152_v29 = vld [vmem:[%s4465_s1 + $0x2c8] ss:$16 sps:$4 sm:$0xff]   ;;  %v3157_v31 = vld [vmem:[%s4465_s1 + $0x2e4] ss:$16 sps:$4 sm:$0xff]  }
  0x2e   : > { %v3211_v30 = vld [vmem:[%s3716_s17 + $0xc] ss:$28 sps:$4 sm:$0xff]   ;;  %v3155_v33 = vld [vmem:[%s4465_s1 + $0x2e0] ss:$16 sps:$4 sm:$0xff]   ;;  %s326_s14 = sand.u32 1, %s3463_s10   ;;  %s2920_s25 = sshll.u32 %s3550_s13, 8 }
  0x2f   : > { %1624 = vmatpush1.bf16.msra.mxu0 %v3066_v34  ;;  %1796 = vmatpush1.bf16.msra.mxu1 %v3067_v35  ;;  %v3160_v32 = vld [vmem:[%s4465_s1 + $0x2ec] ss:$16 sps:$4 sm:$0xff]   ;;  %v3158_v34 = vld [vmem:[%s4465_s1 + $0x2e8] ss:$16 sps:$4 sm:$0xff]   ;;  %v3163_v35 = vld [vmem:[%s4465_s1 + $0x304] ss:$16 sps:$4 sm:$0xff]   ;;  %s4419_s28 = scalar_lea.hbm %s4473_s9, %s2920_s25 }
  0x30   : > { %1625 = vmatprep.subr.bf16.mxu0 %v3068_v36  ;;  %1797 = vmatprep.subr.bf16.mxu1 %v3070_v37  ;;  %v3166_v36 = vld [vmem:[%s4465_s1 + $0x30c] ss:$16 sps:$4 sm:$0xff]   ;;  %v3161_v37 = vld [vmem:[%s4465_s1 + $0x300] ss:$16 sps:$4 sm:$0xff]   ;;  %s2638_s21 = sshll.u32 %s326_s14, 4  ;;  %s4423_s13 = scalar_lea.sflag [#allocation3], %s326_s14 }
  0x31   : > { %v3184_v48 = vld [vmem:[%s4465_s1 + $0x36c] ss:$16 sps:$4 sm:$0xff]   ;;  %s328_s23 = scalar_lea.vmem [#allocation2], %s2638_s21  ;;  %s3476_s29 = smov [#allocation2]  }
  0x32   : > { %s2572_s24 = sshll.u32 %s328_s23, 4  ;;  %s3413_s21 = sshll.u32 %s3476_s29, 4  ;;  %s4414_s24 = int_to_ptr.vmem [resolvable:$true] %s2572_s24  ;;  %s3414_s21 = int_to_ptr.vmem [resolvable:$false] %s3413_s21 }
  0x33   : > { %1626 = vmatpush1.bf16.msra.mxu0 %v3072_v38  ;;  %1798 = vmatpush1.bf16.msra.mxu1 %v3073_v39  ;;  %v3164_v38 = vld [vmem:[%s4465_s1 + $0x308] ss:$16 sps:$4 sm:$0xff]   ;;  %v3169_v39 = vld [vmem:[%s4465_s1 + $0x324] ss:$16 sps:$4 sm:$0xff]   ;;  %s3409_s22 = scalar_lea.vmem %s4414_s24, 256  ;;  %p3416_p0 = scmp.lt.s32.totalorder %s4414_s24, %s3414_s21 }
  0x34   : > { %1627 = vmatprep.subr.bf16.mxu0 %v3074_v40  ;;  %1799 = vmatprep.subr.bf16.mxu1 %v3076_v41  ;;  %v3172_v40 = vld [vmem:[%s4465_s1 + $0x32c] ss:$16 sps:$4 sm:$0xff]   ;;  %v3167_v41 = vld [vmem:[%s4465_s1 + $0x320] ss:$16 sps:$4 sm:$0xff]   ;;  %p3410_p11 = scmp.ne.s32.totalorder %s4414_s24, %s3409_s22 }
  0x36   : > { %p3411_p12 = pnand %p3410_p11, %p3567_p5 }
  0x37   : > { %1628 = vmatpush1.bf16.msra.mxu0 %v3078_v42  ;;  %1800 = vmatpush1.bf16.msra.mxu1 %v3079_v43  ;;  %v3170_v42 = vld [vmem:[%s4465_s1 + $0x328] ss:$16 sps:$4 sm:$0xff]   ;;  %v3175_v43 = vld [vmem:[%s4465_s1 + $0x344] ss:$16 sps:$4 sm:$0xff]  }
  0x38   : > { %1629 = vmatprep.subr.bf16.mxu0 %v3080_v44  ;;  %1801 = vmatprep.subr.bf16.mxu1 %v3082_v45  ;;  %v3178_v44 = vld [vmem:[%s4465_s1 + $0x34c] ss:$16 sps:$4 sm:$0xff]   ;;  %v3173_v45 = vld [vmem:[%s4465_s1 + $0x340] ss:$16 sps:$4 sm:$0xff]   ;;  %p3412_p13 = pneg %p3411_p12 }
  0x3b   : > { %1630 = vmatpush1.bf16.msra.mxu0 %v3084_v46  ;;  %1802 = vmatpush1.bf16.msra.mxu1 %v3085_v47  ;;  %v3176_v46 = vld [vmem:[%s4465_s1 + $0x348] ss:$16 sps:$4 sm:$0xff]   ;;  %v3181_v47 = vld [vmem:[%s4465_s1 + $0x364] ss:$16 sps:$4 sm:$0xff]  }
  0x3c   : > { %1631 = vmatprep.subr.bf16.mxu0 %v3086_v49  ;;  %1803 = vmatprep.subr.bf16.mxu1 %v3088_v50  ;;  %v3179_v49 = vld [vmem:[%s4465_s1 + $0x360] ss:$16 sps:$4 sm:$0xff]   ;;  %v3182_v50 = vld [vmem:[%s4465_s1 + $0x368] ss:$16 sps:$4 sm:$0xff]  }
  0x3f   : > { %1632 = vmatpush1.bf16.msra.mxu0 %v3090_v51  ;;  %1804 = vmatpush1.bf16.msra.mxu1 %v3091_v52  ;;  %v3187_v51 = vld [vmem:[%s4465_s1 + $0x384] ss:$16 sps:$4 sm:$0xff]   ;;  %v3190_v52 = vld [vmem:[%s4465_s1 + $0x38c] ss:$16 sps:$4 sm:$0xff]  }
  0x40   : > { %1633 = vmatprep.subr.bf16.mxu0 %v3092_v53  ;;  %1805 = vmatprep.subr.bf16.mxu1 %v3094_v54  ;;  %v3185_v53 = vld [vmem:[%s4465_s1 + $0x380] ss:$16 sps:$4 sm:$0xff]   ;;  %v3188_v54 = vld [vmem:[%s4465_s1 + $0x388] ss:$16 sps:$4 sm:$0xff]  }
  0x43   : > { %1634 = vmatpush1.bf16.msra.mxu0 %v3096_v55  ;;  %1806 = vmatpush1.bf16.msra.mxu1 %v3097_v56  ;;  %v3193_v55 = vld [vmem:[%s4465_s1 + $0x3a4] ss:$16 sps:$4 sm:$0xff]   ;;  %v3196_v56 = vld [vmem:[%s4465_s1 + $0x3ac] ss:$16 sps:$4 sm:$0xff]  }
  0x44   : > { %1635 = vmatprep.subr.bf16.mxu0 %v3098_v57  ;;  %1807 = vmatprep.subr.bf16.mxu1 %v3100_v58  ;;  %v3191_v57 = vld [vmem:[%s4465_s1 + $0x3a0] ss:$16 sps:$4 sm:$0xff]   ;;  %v3194_v58 = vld [vmem:[%s4465_s1 + $0x3a8] ss:$16 sps:$4 sm:$0xff]  }
  0x47   : > { %1636 = vmatpush1.bf16.msra.mxu0 %v3102_v59  ;;  %1808 = vmatpush1.bf16.msra.mxu1 %v3103_v60  ;;  %v3199_v59 = vld [vmem:[%s4465_s1 + $0x3c4] ss:$16 sps:$4 sm:$0xff]   ;;  %v3202_v60 = vld [vmem:[%s4465_s1 + $0x3cc] ss:$16 sps:$4 sm:$0xff]  }
  0x48   : > { %1637 = vmatprep.subr.bf16.mxu0 %v3104_v61  ;;  %1809 = vmatprep.subr.bf16.mxu1 %v3106_v62  ;;  %v3197_v61 = vld [vmem:[%s4465_s1 + $0x3c0] ss:$16 sps:$4 sm:$0xff]   ;;  %v3200_v62 = vld [vmem:[%s4465_s1 + $0x3c8] ss:$16 sps:$4 sm:$0xff]  }
  0x4b   : > { %1638 = vmatpush1.bf16.msra.mxu0 %v3108_v63  ;;  %1810 = vmatpush1.bf16.msra.mxu1 %v3109_v0  ;;  %v3205_v63 = vld [vmem:[%s4465_s1 + $0x3e4] ss:$16 sps:$4 sm:$0xff]   ;;  %v3208_v0 = vld [vmem:[%s4465_s1 + $0x3ec] ss:$16 sps:$4 sm:$0xff]  }
  0x4c   : > { %1650 = vmatprep.subr.bf16.mxu0 %v3115_v1  ;;  %1822 = vmatprep.subr.bf16.mxu1 %v3118_v2  ;;  %v3203_v1 = vld [vmem:[%s4465_s1 + $0x3e0] ss:$16 sps:$4 sm:$0xff]   ;;  %v3206_v2 = vld [vmem:[%s4465_s1 + $0x3e8] ss:$16 sps:$4 sm:$0xff]  }
  0x4e   : > { %1640 = vmatmul.mubr.bf16.vlgmr.msra.gmra.mrb[0].mxu0 %v3110_v3  ;;  %1812 = vmatmul.mubr.bf16.vlgmr.msra.gmra.mrb[0].mxu1 %v3110_v3  ;;  %v3214_v3 = vld [vmem:[%s4465_s1 + $0x404] ss:$16 sps:$4 sm:$0xff]  }
  0x4f   : > { %1651 = vmatpush1.bf16.msra.mxu0 %v3113_v4  ;;  %1823 = vmatpush1.bf16.msra.mxu1 %v3116_v5  ;;  %v3217_v4 = vld [vmem:[%s4465_s1 + $0x40c] ss:$16 sps:$4 sm:$0xff]   ;;  %v3209_v5 = vld [vmem:[%s3716_s17 + $0x8] ss:$28 sps:$4 sm:$0xff]  }
  0x50   : > { %1652 = vmatprep.subr.bf16.mxu0 %v3121_v6  ;;  %1824 = vmatprep.subr.bf16.mxu1 %v3124_v7  ;;  %v3212_v6 = vld [vmem:[%s4465_s1 + $0x400] ss:$16 sps:$4 sm:$0xff]   ;;  %v3215_v7 = vld [vmem:[%s4465_s1 + $0x408] ss:$16 sps:$4 sm:$0xff]  }
  0x51   : > { %1682 = vmatprep.mubr.bf16.mxu0 %v3211_v30  ;;  %1854 = vmatprep.mubr.bf16.mxu1 %v3211_v30  ;;  %v3253_v30 = vld [vmem:[%s4465_s1 + $0x4cc] ss:$16 sps:$4 sm:$0xff]  }
  0x53   : > { %1653 = vmatpush1.bf16.msra.mxu0 %v3119_v8  ;;  %1825 = vmatpush1.bf16.msra.mxu1 %v3122_v9  ;;  %v3220_v8 = vld [vmem:[%s4465_s1 + $0x424] ss:$16 sps:$4 sm:$0xff]   ;;  %v3223_v9 = vld [vmem:[%s4465_s1 + $0x42c] ss:$16 sps:$4 sm:$0xff]  }
  0x54   : > { %1654 = vmatprep.subr.bf16.mxu0 %v3127_v10  ;;  %1826 = vmatprep.subr.bf16.mxu1 %v3130_v11  ;;  %v3218_v10 = vld [vmem:[%s4465_s1 + $0x420] ss:$16 sps:$4 sm:$0xff]   ;;  %v3221_v11 = vld [vmem:[%s4465_s1 + $0x428] ss:$16 sps:$4 sm:$0xff]  }
  0x57   : > { %1655 = vmatpush1.bf16.msra.mxu0 %v3125_v12  ;;  %1827 = vmatpush1.bf16.msra.mxu1 %v3128_v13  ;;  %v3310_v12 = vld [vmem:[%s3716_s17 + $0x14] ss:$28 sps:$4 sm:$0xff]  }
  0x58   : > { %1656 = vmatprep.subr.bf16.mxu0 %v3133_v14  ;;  %1828 = vmatprep.subr.bf16.mxu1 %v3136_v15  ;;  %v3226_v13 = vld [vmem:[%s4465_s1 + $0x444] ss:$16 sps:$4 sm:$0xff]   ;;  %v3229_v14 = vld [vmem:[%s4465_s1 + $0x44c] ss:$16 sps:$4 sm:$0xff]   ;;  %v3224_v15 = vld [vmem:[%s4465_s1 + $0x440] ss:$16 sps:$4 sm:$0xff]  }
  0x5b   : > { %1657 = vmatpush1.bf16.msra.mxu0 %v3131_v16  ;;  %1829 = vmatpush1.bf16.msra.mxu1 %v3134_v17  ;;  %v3227_v16 = vld [vmem:[%s4465_s1 + $0x448] ss:$16 sps:$4 sm:$0xff]   ;;  %v3232_v17 = vld [vmem:[%s4465_s1 + $0x464] ss:$16 sps:$4 sm:$0xff]  }
  0x5c   : > { %1658 = vmatprep.subr.bf16.mxu0 %v3139_v18  ;;  %1830 = vmatprep.subr.bf16.mxu1 %v3142_v19  ;;  %v3235_v18 = vld [vmem:[%s4465_s1 + $0x46c] ss:$16 sps:$4 sm:$0xff]   ;;  %v3230_v19 = vld [vmem:[%s4465_s1 + $0x460] ss:$16 sps:$4 sm:$0xff]  }
  0x5f   : > { %1659 = vmatpush1.bf16.msra.mxu0 %v3137_v20  ;;  %1831 = vmatpush1.bf16.msra.mxu1 %v3140_v21  ;;  %v3233_v20 = vld [vmem:[%s4465_s1 + $0x468] ss:$16 sps:$4 sm:$0xff]   ;;  %v3238_v21 = vld [vmem:[%s4465_s1 + $0x484] ss:$16 sps:$4 sm:$0xff]  }
  0x60   : > { %1660 = vmatprep.subr.bf16.mxu0 %v3145_v22  ;;  %1832 = vmatprep.subr.bf16.mxu1 %v3148_v23  ;;  %v3241_v22 = vld [vmem:[%s4465_s1 + $0x48c] ss:$16 sps:$4 sm:$0xff]   ;;  %v3236_v23 = vld [vmem:[%s4465_s1 + $0x480] ss:$16 sps:$4 sm:$0xff]  }
  0x63   : > { %1661 = vmatpush1.bf16.msra.mxu0 %v3143_v24  ;;  %1833 = vmatpush1.bf16.msra.mxu1 %v3146_v25  ;;  %v3239_v24 = vld [vmem:[%s4465_s1 + $0x488] ss:$16 sps:$4 sm:$0xff]   ;;  %v3244_v25 = vld [vmem:[%s4465_s1 + $0x4a4] ss:$16 sps:$4 sm:$0xff]  }
  0x64   : > { %1662 = vmatprep.subr.bf16.mxu0 %v3151_v26  ;;  %1834 = vmatprep.subr.bf16.mxu1 %v3154_v27  ;;  %v3247_v26 = vld [vmem:[%s4465_s1 + $0x4ac] ss:$16 sps:$4 sm:$0xff]   ;;  %v3242_v27 = vld [vmem:[%s4465_s1 + $0x4a0] ss:$16 sps:$4 sm:$0xff]  }
  0x67   : > { %1663 = vmatpush1.bf16.msra.mxu0 %v3149_v28  ;;  %1835 = vmatpush1.bf16.msra.mxu1 %v3152_v29  ;;  %v3245_v28 = vld [vmem:[%s4465_s1 + $0x4a8] ss:$16 sps:$4 sm:$0xff]   ;;  %v3250_v29 = vld [vmem:[%s4465_s1 + $0x4c4] ss:$16 sps:$4 sm:$0xff]  }
  0x68   : > { %1664 = vmatprep.subr.bf16.mxu0 %v3157_v31  ;;  %1836 = vmatprep.subr.bf16.mxu1 %v3160_v32  ;;  %v3248_v31 = vld [vmem:[%s4465_s1 + $0x4c0] ss:$16 sps:$4 sm:$0xff]   ;;  %v3251_v32 = vld [vmem:[%s4465_s1 + $0x4c8] ss:$16 sps:$4 sm:$0xff]  }
  0x6b   : > { %1665 = vmatpush1.bf16.msra.mxu0 %v3155_v33  ;;  %1837 = vmatpush1.bf16.msra.mxu1 %v3158_v34  ;;  %v3256_v33 = vld [vmem:[%s4465_s1 + $0x4e4] ss:$16 sps:$4 sm:$0xff]   ;;  %v3259_v34 = vld [vmem:[%s4465_s1 + $0x4ec] ss:$16 sps:$4 sm:$0xff]  }
  0x6c   : > { %1666 = vmatprep.subr.bf16.mxu0 %v3163_v35  ;;  %1838 = vmatprep.subr.bf16.mxu1 %v3166_v36  ;;  %v3254_v35 = vld [vmem:[%s4465_s1 + $0x4e0] ss:$16 sps:$4 sm:$0xff]   ;;  %v3257_v36 = vld [vmem:[%s4465_s1 + $0x4e8] ss:$16 sps:$4 sm:$0xff]  }
  0x6f   : > { %1667 = vmatpush1.bf16.msra.mxu0 %v3161_v37  ;;  %1839 = vmatpush1.bf16.msra.mxu1 %v3164_v38  ;;  %v3262_v37 = vld [vmem:[%s4465_s1 + $0x504] ss:$16 sps:$4 sm:$0xff]   ;;  %v3265_v38 = vld [vmem:[%s4465_s1 + $0x50c] ss:$16 sps:$4 sm:$0xff]  }
  0x70   : > { %1668 = vmatprep.subr.bf16.mxu0 %v3169_v39  ;;  %1840 = vmatprep.subr.bf16.mxu1 %v3172_v40  ;;  %v3260_v39 = vld [vmem:[%s4465_s1 + $0x500] ss:$16 sps:$4 sm:$0xff]   ;;  %v3263_v40 = vld [vmem:[%s4465_s1 + $0x508] ss:$16 sps:$4 sm:$0xff]  }
  0x73   : > { %1669 = vmatpush1.bf16.msra.mxu0 %v3167_v41  ;;  %1841 = vmatpush1.bf16.msra.mxu1 %v3170_v42  ;;  %v3268_v41 = vld [vmem:[%s4465_s1 + $0x524] ss:$16 sps:$4 sm:$0xff]   ;;  %v3271_v42 = vld [vmem:[%s4465_s1 + $0x52c] ss:$16 sps:$4 sm:$0xff]  }
  0x74   : > { %1670 = vmatprep.subr.bf16.mxu0 %v3175_v43  ;;  %1842 = vmatprep.subr.bf16.mxu1 %v3178_v44  ;;  %v3266_v43 = vld [vmem:[%s4465_s1 + $0x520] ss:$16 sps:$4 sm:$0xff]   ;;  %v3269_v44 = vld [vmem:[%s4465_s1 + $0x528] ss:$16 sps:$4 sm:$0xff]  }
  0x77   : > { %1671 = vmatpush1.bf16.msra.mxu0 %v3173_v45  ;;  %1843 = vmatpush1.bf16.msra.mxu1 %v3176_v46  ;;  %v3274_v45 = vld [vmem:[%s4465_s1 + $0x544] ss:$16 sps:$4 sm:$0xff]   ;;  %v3277_v46 = vld [vmem:[%s4465_s1 + $0x54c] ss:$16 sps:$4 sm:$0xff]  }
  0x78   : > { %1672 = vmatprep.subr.bf16.mxu0 %v3181_v47  ;;  %1844 = vmatprep.subr.bf16.mxu1 %v3184_v48  ;;  %v3272_v47 = vld [vmem:[%s4465_s1 + $0x540] ss:$16 sps:$4 sm:$0xff]   ;;  %v3275_v48 = vld [vmem:[%s4465_s1 + $0x548] ss:$16 sps:$4 sm:$0xff]  }
  0x7b   : > { %1673 = vmatpush1.bf16.msra.mxu0 %v3179_v49  ;;  %1845 = vmatpush1.bf16.msra.mxu1 %v3182_v50  ;;  %v3280_v49 = vld [vmem:[%s4465_s1 + $0x564] ss:$16 sps:$4 sm:$0xff]   ;;  %v3283_v50 = vld [vmem:[%s4465_s1 + $0x56c] ss:$16 sps:$4 sm:$0xff]  }
  0x7c   : > { %1674 = vmatprep.subr.bf16.mxu0 %v3187_v51  ;;  %1846 = vmatprep.subr.bf16.mxu1 %v3190_v52  ;;  %v3278_v51 = vld [vmem:[%s4465_s1 + $0x560] ss:$16 sps:$4 sm:$0xff]   ;;  %v3281_v52 = vld [vmem:[%s4465_s1 + $0x568] ss:$16 sps:$4 sm:$0xff]  }
  0x7f   : > { %1675 = vmatpush1.bf16.msra.mxu0 %v3185_v53  ;;  %1847 = vmatpush1.bf16.msra.mxu1 %v3188_v54  ;;  %v3286_v53 = vld [vmem:[%s4465_s1 + $0x584] ss:$16 sps:$4 sm:$0xff]   ;;  %v3289_v54 = vld [vmem:[%s4465_s1 + $0x58c] ss:$16 sps:$4 sm:$0xff]  }
  0x80   : > { %1676 = vmatprep.subr.bf16.mxu0 %v3193_v55  ;;  %1848 = vmatprep.subr.bf16.mxu1 %v3196_v56  ;;  %v3284_v55 = vld [vmem:[%s4465_s1 + $0x580] ss:$16 sps:$4 sm:$0xff]   ;;  %v3287_v56 = vld [vmem:[%s4465_s1 + $0x588] ss:$16 sps:$4 sm:$0xff]  }
  0x83   : > { %1677 = vmatpush1.bf16.msra.mxu0 %v3191_v57  ;;  %1849 = vmatpush1.bf16.msra.mxu1 %v3194_v58  ;;  %v3292_v57 = vld [vmem:[%s4465_s1 + $0x5a4] ss:$16 sps:$4 sm:$0xff]   ;;  %v3295_v58 = vld [vmem:[%s4465_s1 + $0x5ac] ss:$16 sps:$4 sm:$0xff]  }
  0x84   : > { %1678 = vmatprep.subr.bf16.mxu0 %v3199_v59  ;;  %1850 = vmatprep.subr.bf16.mxu1 %v3202_v60  ;;  %v3290_v59 = vld [vmem:[%s4465_s1 + $0x5a0] ss:$16 sps:$4 sm:$0xff]   ;;  %v3293_v60 = vld [vmem:[%s4465_s1 + $0x5a8] ss:$16 sps:$4 sm:$0xff]  }
  0x87   : > { %1679 = vmatpush1.bf16.msra.mxu0 %v3197_v61  ;;  %1851 = vmatpush1.bf16.msra.mxu1 %v3200_v62  ;;  %v3298_v61 = vld [vmem:[%s4465_s1 + $0x5c4] ss:$16 sps:$4 sm:$0xff]   ;;  %v3301_v62 = vld [vmem:[%s4465_s1 + $0x5cc] ss:$16 sps:$4 sm:$0xff]  }
  0x88   : > { %1680 = vmatprep.subr.bf16.mxu0 %v3205_v63  ;;  %1852 = vmatprep.subr.bf16.mxu1 %v3208_v0  ;;  %v3296_v63 = vld [vmem:[%s4465_s1 + $0x5c0] ss:$16 sps:$4 sm:$0xff]   ;;  %v3299_v0 = vld [vmem:[%s4465_s1 + $0x5c8] ss:$16 sps:$4 sm:$0xff]  }
  0x8b   : > { %1681 = vmatpush1.bf16.msra.mxu0 %v3203_v1  ;;  %1853 = vmatpush1.bf16.msra.mxu1 %v3206_v2  ;;  %v3304_v1 = vld [vmem:[%s4465_s1 + $0x5e4] ss:$16 sps:$4 sm:$0xff]   ;;  %v3307_v2 = vld [vmem:[%s4465_s1 + $0x5ec] ss:$16 sps:$4 sm:$0xff]  }
  0x8c   : > { %1693 = vmatprep.subr.bf16.mxu0 %v3214_v3  ;;  %1865 = vmatprep.subr.bf16.mxu1 %v3217_v4  ;;  %v3302_v3 = vld [vmem:[%s4465_s1 + $0x5e0] ss:$16 sps:$4 sm:$0xff]   ;;  %v3305_v4 = vld [vmem:[%s4465_s1 + $0x5e8] ss:$16 sps:$4 sm:$0xff]  }
  0x8e   : > { %1683 = vmatmul.mubr.bf16.vlgmr.msra.gmra.mrb[0].mxu0 %v3209_v5  ;;  %1855 = vmatmul.mubr.bf16.vlgmr.msra.gmra.mrb[0].mxu1 %v3209_v5  ;;  %v3313_v5 = vld [vmem:[%s4465_s1 + $0x604] ss:$16 sps:$4 sm:$0xff]  }
  0x8f   : > { %1694 = vmatpush1.bf16.msra.mxu0 %v3212_v6  ;;  %1866 = vmatpush1.bf16.msra.mxu1 %v3215_v7  ;;  %v3356_v6 = vld [vmem:[%s4467_s3 + $0x104] ss:$8 sps:$4 sm:$0xff]  }
  0x90   : > { %1695 = vmatprep.subr.bf16.mxu0 %v3220_v8  ;;  %1867 = vmatprep.subr.bf16.mxu1 %v3223_v9  ;;  %v3308_v7 = vld [vmem:[%s3716_s17 + $0x10] ss:$28 sps:$4 sm:$0xff]   ;;  %v3316_v9 = vld [vmem:[%s4465_s1 + $0x624] ss:$16 sps:$4 sm:$0xff]  }
  0x91   : > { %1725 = vmatprep.mubr.bf16.mxu0 %v3310_v12  ;;  %1897 = vmatprep.mubr.bf16.mxu1 %v3310_v12  ;;  %v3311_v8 = vld [vmem:[%s4465_s1 + $0x600] ss:$16 sps:$4 sm:$0xff]  }
  0x92   : > { %v3314_v12 = vld [vmem:[%s4465_s1 + $0x620] ss:$16 sps:$4 sm:$0xff]  }
  0x93   : > { %1696 = vmatpush1.bf16.msra.mxu0 %v3218_v10  ;;  %1868 = vmatpush1.bf16.msra.mxu1 %v3221_v11  ;;  %v3354_v10 = vld [vmem:[%s4467_s3 + $0x100] ss:$8 sps:$4 sm:$0xff]   ;;  %v3362_v11 = vld [vmem:[%s4467_s3 + $0x114] ss:$8 sps:$4 sm:$0xff]  }
  0x94   : > { %1697 = vmatprep.subr.bf16.mxu0 %v3226_v13  ;;  %1869 = vmatprep.subr.bf16.mxu1 %v3229_v14  ;;  %v3473_v13 = vmov 0   ;;  %v3320_v14 = vld [vmem:[%s4465_s1 + $0x60c] ss:$16 sps:$4 sm:$0xff]  }
  0x97   : > { %1698 = vmatpush1.bf16.msra.mxu0 %v3224_v15  ;;  %1870 = vmatpush1.bf16.msra.mxu1 %v3227_v16  ;;  %v3360_v15 = vld [vmem:[%s4467_s3 + $0x110] ss:$8 sps:$4 sm:$0xff]  }
  0x98   : > { %1699 = vmatprep.subr.bf16.mxu0 %v3232_v17  ;;  %1871 = vmatprep.subr.bf16.mxu1 %v3235_v18  ;;  %v3317_v16 = vld [vmem:[%s3716_s17 + $0x18] ss:$28 sps:$4 sm:$0xff]   ;;  %v3323_v18 = vld [vmem:[%s4465_s1 + $0x62c] ss:$16 sps:$4 sm:$0xff]   ;;  %s3415_s17 = scalar_lea.vmem %s3414_s21, 512 }
  0x99   : > { %v3318_v17 = vld [vmem:[%s4465_s1 + $0x608] ss:$16 sps:$4 sm:$0xff]   ;;  %p3417_p1 = scmp.lt.s32.totalorder %s3415_s17, %s3409_s22 }
  0x9b   : > { %1700 = vmatpush1.bf16.msra.mxu0 %v3230_v19  ;;  %1872 = vmatpush1.bf16.msra.mxu1 %v3233_v20  ;;  %v3321_v19 = vld [vmem:[%s4465_s1 + $0x628] ss:$16 sps:$4 sm:$0xff]   ;;  %v3326_v20 = vld [vmem:[%s4467_s3 + $0x4] ss:$8 sps:$4 sm:$0xff]   ;;  %p3418_p2 = por %p3417_p1, %p3416_p0 }
  0x9c   : > { %1701 = vmatprep.subr.bf16.mxu0 %v3238_v21  ;;  %1873 = vmatprep.subr.bf16.mxu1 %v3241_v22  ;;  %v3324_v21 = vld [vmem:[%s4467_s3] ss:$8 sps:$4 sm:$0xff]   ;;  %v3329_v22 = vld [vmem:[%s4467_s3 + $0x14] ss:$8 sps:$4 sm:$0xff]  }
  0x9d   : > { %p3419_p3 = pnand %p3418_p2, %p3412_p13 }
  0x9f   : > { %1702 = vmatpush1.bf16.msra.mxu0 %v3236_v23  ;;  %1874 = vmatpush1.bf16.msra.mxu1 %v3239_v24  ;;  %v3327_v23 = vld [vmem:[%s4467_s3 + $0x10] ss:$8 sps:$4 sm:$0xff]   ;;  %v3332_v24 = vld [vmem:[%s4467_s3 + $0x24] ss:$8 sps:$4 sm:$0xff]  }
  0xa0   : > { %1703 = vmatprep.subr.bf16.mxu0 %v3244_v25  ;;  %1875 = vmatprep.subr.bf16.mxu1 %v3247_v26  ;;  %v3330_v25 = vld [vmem:[%s4467_s3 + $0x20] ss:$8 sps:$4 sm:$0xff]   ;;  %v3335_v26 = vld [vmem:[%s4467_s3 + $0x34] ss:$8 sps:$4 sm:$0xff]  }
  0xa3   : > { %1704 = vmatpush1.bf16.msra.mxu0 %v3242_v27  ;;  %1876 = vmatpush1.bf16.msra.mxu1 %v3245_v28  ;;  %v3333_v27 = vld [vmem:[%s4467_s3 + $0x30] ss:$8 sps:$4 sm:$0xff]   ;;  %v3338_v28 = vld [vmem:[%s4467_s3 + $0x44] ss:$8 sps:$4 sm:$0xff]  }
  0xa4   : > { %1705 = vmatprep.subr.bf16.mxu0 %v3250_v29  ;;  %1877 = vmatprep.subr.bf16.mxu1 %v3253_v30  ;;  %v3336_v29 = vld [vmem:[%s4467_s3 + $0x40] ss:$8 sps:$4 sm:$0xff]   ;;  %v3341_v30 = vld [vmem:[%s4467_s3 + $0x54] ss:$8 sps:$4 sm:$0xff]  }
  0xa7   : > { %1706 = vmatpush1.bf16.msra.mxu0 %v3248_v31  ;;  %1878 = vmatpush1.bf16.msra.mxu1 %v3251_v32  ;;  %v3339_v31 = vld [vmem:[%s4467_s3 + $0x50] ss:$8 sps:$4 sm:$0xff]   ;;  %v3344_v32 = vld [vmem:[%s4467_s3 + $0x64] ss:$8 sps:$4 sm:$0xff]  }
  0xa8   : > { %1707 = vmatprep.subr.bf16.mxu0 %v3256_v33  ;;  %1879 = vmatprep.subr.bf16.mxu1 %v3259_v34  ;;  %v3342_v33 = vld [vmem:[%s4467_s3 + $0x60] ss:$8 sps:$4 sm:$0xff]   ;;  %v3347_v34 = vld [vmem:[%s4467_s3 + $0x74] ss:$8 sps:$4 sm:$0xff]  }
  0xab   : > { %1708 = vmatpush1.bf16.msra.mxu0 %v3254_v35  ;;  %1880 = vmatpush1.bf16.msra.mxu1 %v3257_v36  ;;  %v3345_v35 = vld [vmem:[%s4467_s3 + $0x70] ss:$8 sps:$4 sm:$0xff]   ;;  %v3350_v36 = vld [vmem:[%s4467_s3 + $0x84] ss:$8 sps:$4 sm:$0xff]  }
  0xac   : > { %1709 = vmatprep.subr.bf16.mxu0 %v3262_v37  ;;  %1881 = vmatprep.subr.bf16.mxu1 %v3265_v38  ;;  %v3348_v37 = vld [vmem:[%s4467_s3 + $0x80] ss:$8 sps:$4 sm:$0xff]   ;;  %v3353_v38 = vld [vmem:[%s4467_s3 + $0x94] ss:$8 sps:$4 sm:$0xff]  }
  0xaf   : > { %1710 = vmatpush1.bf16.msra.mxu0 %v3260_v39  ;;  %1882 = vmatpush1.bf16.msra.mxu1 %v3263_v40  ;;  %v3351_v39 = vld [vmem:[%s4467_s3 + $0x90] ss:$8 sps:$4 sm:$0xff]   ;;  %v3359_v40 = vld [vmem:[%s4467_s3 + $0xa4] ss:$8 sps:$4 sm:$0xff]  }
  0xb0   : > { %1711 = vmatprep.subr.bf16.mxu0 %v3268_v41  ;;  %1883 = vmatprep.subr.bf16.mxu1 %v3271_v42  ;;  %v3357_v41 = vld [vmem:[%s4467_s3 + $0xa0] ss:$8 sps:$4 sm:$0xff]   ;;  %v3365_v42 = vld [vmem:[%s4467_s3 + $0xb4] ss:$8 sps:$4 sm:$0xff]  }
  0xb3   : > { %1712 = vmatpush1.bf16.msra.mxu0 %v3266_v43  ;;  %1884 = vmatpush1.bf16.msra.mxu1 %v3269_v44  ;;  %v3368_v43 = vld [vmem:[%s4467_s3 + $0x124] ss:$8 sps:$4 sm:$0xff]   ;;  %v3363_v44 = vld [vmem:[%s4467_s3 + $0xb0] ss:$8 sps:$4 sm:$0xff]  }
  0xb4   : > { %1713 = vmatprep.subr.bf16.mxu0 %v3274_v45  ;;  %1885 = vmatprep.subr.bf16.mxu1 %v3277_v46  ;;  %v3366_v45 = vld [vmem:[%s4467_s3 + $0x120] ss:$8 sps:$4 sm:$0xff]  }
  0xb5   : > { %v3369_v46 = vld [vmem:[%s4467_s3 + $0xc0] ss:$8 sps:$4 sm:$0xff]  }
  0xb7   : > { %1714 = vmatpush1.bf16.msra.mxu0 %v3272_v47  ;;  %1886 = vmatpush1.bf16.msra.mxu1 %v3275_v48  ;;  %v3371_v47 = vld [vmem:[%s4467_s3 + $0xc4] ss:$8 sps:$4 sm:$0xff]   ;;  %v3372_v48 = vld [vmem:[%s4467_s3 + $0x130] ss:$8 sps:$4 sm:$0xff]  }
  0xb8   : > { %1715 = vmatprep.subr.bf16.mxu0 %v3280_v49  ;;  %1887 = vmatprep.subr.bf16.mxu1 %v3283_v50  ;;  %v3374_v49 = vld [vmem:[%s4467_s3 + $0x134] ss:$8 sps:$4 sm:$0xff]  }
  0xb9   : > { %v3377_v50 = vld [vmem:[%s4467_s3 + $0xd4] ss:$8 sps:$4 sm:$0xff]  }
  0xbb   : > { %1716 = vmatpush1.bf16.msra.mxu0 %v3278_v51  ;;  %1888 = vmatpush1.bf16.msra.mxu1 %v3281_v52  ;;  %v3380_v51 = vld [vmem:[%s4467_s3 + $0x144] ss:$8 sps:$4 sm:$0xff]   ;;  %v3375_v52 = vld [vmem:[%s4467_s3 + $0xd0] ss:$8 sps:$4 sm:$0xff]  }
  0xbc   : > { %1717 = vmatprep.subr.bf16.mxu0 %v3286_v53  ;;  %1889 = vmatprep.subr.bf16.mxu1 %v3289_v54  ;;  %v3378_v53 = vld [vmem:[%s4467_s3 + $0x140] ss:$8 sps:$4 sm:$0xff]   ;;  %v3383_v54 = vld [vmem:[%s4467_s3 + $0xe4] ss:$8 sps:$4 sm:$0xff]  }
  0xbf   : > { %1718 = vmatpush1.bf16.msra.mxu0 %v3284_v55  ;;  %1890 = vmatpush1.bf16.msra.mxu1 %v3287_v56  ;;  %v3386_v55 = vld [vmem:[%s4467_s3 + $0x154] ss:$8 sps:$4 sm:$0xff]   ;;  %v3381_v56 = vld [vmem:[%s4467_s3 + $0xe0] ss:$8 sps:$4 sm:$0xff]  }
  0xc0   : > { %1719 = vmatprep.subr.bf16.mxu0 %v3292_v57  ;;  %1891 = vmatprep.subr.bf16.mxu1 %v3295_v58  ;;  %v3384_v57 = vld [vmem:[%s4467_s3 + $0x150] ss:$8 sps:$4 sm:$0xff]   ;;  %v3389_v58 = vld [vmem:[%s4467_s3 + $0xf4] ss:$8 sps:$4 sm:$0xff]  }
  0xc3   : > { %1720 = vmatpush1.bf16.msra.mxu0 %v3290_v59  ;;  %1892 = vmatpush1.bf16.msra.mxu1 %v3293_v60  ;;  %v3392_v59 = vld [vmem:[%s4467_s3 + $0x164] ss:$8 sps:$4 sm:$0xff]   ;;  %v3387_v60 = vld [vmem:[%s4467_s3 + $0xf0] ss:$8 sps:$4 sm:$0xff]  }
  0xc4   : > { %1721 = vmatprep.subr.bf16.mxu0 %v3298_v61  ;;  %1893 = vmatprep.subr.bf16.mxu1 %v3301_v62  ;;  %v3390_v61 = vld [vmem:[%s4467_s3 + $0x160] ss:$8 sps:$4 sm:$0xff]   ;;  %v3395_v62 = vld [vmem:[%s4467_s3 + $0x174] ss:$8 sps:$4 sm:$0xff]  }
  0xc7   : > { %1722 = vmatpush1.bf16.msra.mxu0 %v3296_v63  ;;  %1894 = vmatpush1.bf16.msra.mxu1 %v3299_v0  ;;  %v3393_v63 = vld [vmem:[%s4467_s3 + $0x170] ss:$8 sps:$4 sm:$0xff]   ;;  %v3398_v0 = vld [vmem:[%s4467_s3 + $0x184] ss:$8 sps:$4 sm:$0xff]  }
  0xc8   : > { %1723 = vmatprep.subr.bf16.mxu0 %v3304_v1  ;;  %1895 = vmatprep.subr.bf16.mxu1 %v3307_v2  ;;  %v3396_v1 = vld [vmem:[%s4467_s3 + $0x180] ss:$8 sps:$4 sm:$0xff]   ;;  %v548_v2 = vlaneseq }
  0xcb   : > { %1724 = vmatpush1.bf16.msra.mxu0 %v3302_v3  ;;  %1896 = vmatpush1.bf16.msra.mxu1 %v3305_v4 }
  0xcc   : > { %1736 = vmatprep.subr.bf16.mxu0 %v3313_v5  ;;  %2322 = vmatprep.subr.bf16.mxu1 %v3356_v6  ;;  %v4345_v6 = vshrl.u32 %v548_v2, 7 }
  0xce   : > { %1726 = vmatmul.mubr.bf16.vlgmr.msra.gmra.mrb[0].mxu0 %v3308_v7  ;;  %1898 = vmatmul.mubr.bf16.vlgmr.msra.gmra.mrb[0].mxu1 %v3308_v7 }
  0xcf   : > { %1737 = vmatpush1.bf16.msra.mxu0 %v3311_v8  ;;  %1768 = vmatprep.mubr.bf16.mxu0 %v3473_v13  ;;  %v550_v8 = vsub.s32 0, %v4345_v6 }
  0xd0   : > { %1738 = vmatprep.subr.bf16.mxu0 %v3316_v9  ;;  %2323 = vmatpush1.bf16.msra.mxu1 %v3354_v10  ;;  %v554_v9 = vsub.s32 1, %v4345_v6  ;;  %v546_v10 = vld [vmem:[%s4466_s2] sm:$0xf] }
  0xd1   : > { %2324 = vmatprep.subr.bf16.mxu1 %v3362_v11  ;;  %v551_v11 = vrot.slane %v546_v10, %v550_v8 }
  0xd3   : > { %1739 = vmatpush1.bf16.msra.mxu0 %v3314_v12  ;;  %v555_v12 = vrot.slane %v546_v10, %v554_v9 }
  0xd4   : > { %1908 = vmatprep.subr.bf16.mxu0 %v3320_v14  ;;  %2325 = vmatpush1.bf16.msra.mxu1 %v3360_v15  ;;  %v558_v14 = vsub.s32 2, %v4345_v6  ;;  %v562_v15 = vsub.s32 3, %v4345_v6  ;;  %v3474_v6 = vmov 0.0  }
  0xd5   : > { %2326 = vmatprep.subr.bf16.mxu1 %v3368_v43 }
  0xd8   : > { %2327 = vmatpush1.bf16.msra.mxu1 %v3366_v45 }
  0xd9   : > { %2328 = vmatprep.subr.bf16.mxu1 %v3374_v49 }
  0xda   : > { %2848 = vmatmul.mubr.msk.bf16.vlgmr.msra.gmra.mrb[0].mxu0 %vm1603_vm0, %v3317_v16 }
  0xdb   : > { %1909 = vmatpush1.bf16.msra.mxu0 %v3318_v17  ;;  %1940 = vmatprep.mubr.bf16.mxu0 %v3473_v13 }
  0xdc   : > { %1910 = vmatprep.subr.bf16.mxu0 %v3323_v18  ;;  %2329 = vmatpush1.bf16.msra.mxu1 %v3372_v48 }
  0xdd   : > { %2330 = vmatprep.subr.bf16.mxu1 %v3380_v51  ;;  %v3400_v51 = vld [vmem:[%s4469_s5 + $0x8] sm:$0xff]  }
  0xdf   : > { %1911 = vmatpush1.bf16.msra.mxu0 %v3321_v19 }
  0xe0   : > { %2279 = vmatprep.subr.bf16.mxu0 %v3326_v20  ;;  %2331 = vmatpush1.bf16.msra.mxu1 %v3378_v53  ;;  %v3402_v53 = vld [vmem:[%s4469_s5 + $0x18] sm:$0xff]  }
  0xe1   : > { %2332 = vmatprep.subr.bf16.mxu1 %v3386_v55  ;;  %v3404_v55 = vld [vmem:[%s4469_s5 + $0x28] sm:$0xff]  }
  0xe2   : > { %2849 = vmatmul.mubr.msk.bf16.vlgmr.msra.gmra.mrb[4].mxu0 %vm1603_vm0, %v3317_v16 }
  0xe3   : > { %2280 = vmatpush1.bf16.msra.mxu0 %v3324_v21  ;;  %v559_v21 = vrot.slane %v546_v10, %v558_v14 }
  0xe4   : > { %2281 = vmatprep.subr.bf16.mxu0 %v3329_v22  ;;  %2333 = vmatpush1.bf16.msra.mxu1 %v3384_v57  ;;  %v3406_v57 = vld [vmem:[%s4469_s5 + $0x38] sm:$0xff]  }
  0xe5   : > { %2334 = vmatprep.subr.bf16.mxu1 %v3392_v59  ;;  %v2013_v59 = vld [vmem:[%s4468_s4] sm:$0x3] }
  0xe7   : > { %2282 = vmatpush1.bf16.msra.mxu0 %v3327_v23 }
  0xe8   : > { %2283 = vmatprep.subr.bf16.mxu0 %v3332_v24  ;;  %2335 = vmatpush1.bf16.msra.mxu1 %v3390_v61  ;;  %v563_v24 = vrot.slane %v546_v10, %v562_v15 }
  0xe9   : > { %2336 = vmatprep.subr.bf16.mxu1 %v3395_v62 }
  0xeb   : > { %2284 = vmatpush1.bf16.msra.mxu0 %v3330_v25 }
  0xec   : > { %2285 = vmatprep.subr.bf16.mxu0 %v3335_v26  ;;  %2337 = vmatpush1.bf16.msra.mxu1 %v3393_v63 }
  0xed   : > { %2338 = vmatprep.subr.bf16.mxu1 %v3398_v0 }
  0xef   : > { %2286 = vmatpush1.bf16.msra.mxu0 %v3333_v27 }
  0xf0   : > { %2287 = vmatprep.subr.bf16.mxu0 %v3338_v28  ;;  %2339 = vmatpush1.bf16.msra.mxu1 %v3396_v1 }
  0xf1   : > { %2453 = vmatprep.subr.bf16.mxu1 %v3473_v13 }
  0xf3   : > { %2288 = vmatpush1.bf16.msra.mxu0 %v3336_v29 }
  0xf4   : > { %2289 = vmatprep.subr.bf16.mxu0 %v3341_v30 }
  0xf7   : > { %2290 = vmatpush1.bf16.msra.mxu0 %v3339_v31 }
  0xf8   : > { %2291 = vmatprep.subr.bf16.mxu0 %v3344_v32 }
  0xfb   : > { %2292 = vmatpush1.bf16.msra.mxu0 %v3342_v33 }
  0xfc   : > { %2293 = vmatprep.subr.bf16.mxu0 %v3347_v34 }
  0xff   : > { %2294 = vmatpush1.bf16.msra.mxu0 %v3345_v35 }
 0x100   : > { %2295 = vmatprep.subr.bf16.mxu0 %v3350_v36 }
 0x103   : > { %2296 = vmatpush1.bf16.msra.mxu0 %v3348_v37 }
 0x104   : > { %2297 = vmatprep.subr.bf16.mxu0 %v3353_v38 }
 0x107   : > { %2298 = vmatpush1.bf16.msra.mxu0 %v3351_v39 }
 0x108   : > { %2299 = vmatprep.subr.bf16.mxu0 %v3359_v40 }
 0x10b   : > { %2300 = vmatpush1.bf16.msra.mxu0 %v3357_v41 }
 0x10c   : > { %2301 = vmatprep.subr.bf16.mxu0 %v3365_v42 }
 0x10f   : > { %2302 = vmatpush1.bf16.msra.mxu0 %v3363_v44 }
 0x110   : > { %2303 = vmatprep.subr.bf16.mxu0 %v3371_v47 }
 0x113   : > { %2304 = vmatpush1.bf16.msra.mxu0 %v3369_v46 }
 0x114   : > { %2305 = vmatprep.subr.bf16.mxu0 %v3377_v50  ;;  %v3399_v50 = vld [vmem:[%s4469_s5] sm:$0xff]  }
 0x117   : > { %2306 = vmatpush1.bf16.msra.mxu0 %v3375_v52  ;;  %v3401_v52 = vld [vmem:[%s4469_s5 + $0x10] sm:$0xff]  }
 0x118   : > { %2307 = vmatprep.subr.bf16.mxu0 %v3383_v54  ;;  %v3403_v54 = vld [vmem:[%s4469_s5 + $0x20] sm:$0xff]  }
 0x11b   : > { %2308 = vmatpush1.bf16.msra.mxu0 %v3381_v56  ;;  %v3405_v56 = vld [vmem:[%s4469_s5 + $0x30] sm:$0xff]  }
 0x11c   : > { %2309 = vmatprep.subr.bf16.mxu0 %v3389_v58  ;;  %v3407_v58 = vld [vmem:[%s4469_s5 + $0x40] sm:$0xff]  }
 0x11f   : > { %2310 = vmatpush1.bf16.msra.mxu0 %v3387_v60  ;;  %v2018_v60 = vrot.slane %v2013_v59, %v550_v8 }
 0x1a1   : > { %v1899_v3 = vpop.f32.mrb[0].mxu1 }
 0x1a2   : > { %v1901_v4 = vpop.f32.mrb[1].mxu1  ;;  %v2933_v30 = vadd.f32 %v1899_v3, %v559_v21 }
 0x1a3   : > { %v1903_v5 = vpop.f32.mrb[2].mxu1  ;;  %v2935_v32 = vadd.f32 %v1901_v4, %v563_v24 }
 0x1a4   : > { %v1905_v7 = vpop.f32.mrb[3].mxu1  ;;  %v2937_v35 = vadd.f32 %v1903_v5, %v559_v21 }
 0x1a5   : > { %v2939_v38 = vadd.f32 %v1905_v7, %v563_v24 }
 0x1ad   : > { %v1770_v16 = vpop.f32.mrb[0].mxu0 }
 0x1ae   : > { %v2929_v17 = vadd.f32 %v1770_v16, %v551_v11  ;;  %v1772_v18 = vpop.f32.mrb[1].mxu0 }
 0x1af   : > { %v2930_v19 = vadd.f32 %v1772_v18, %v555_v12  ;;  %v1774_v20 = vpop.f32.mrb[2].mxu0 }
 0x1b0   : > { %v2931_v22 = vadd.f32 %v1774_v20, %v551_v11  ;;  %v1776_v23 = vpop.f32.mrb[3].mxu0  ;;  %v1951_v26 = vmax.f32 %v2929_v17, 0.0 }
 0x1b1   : > { %v2932_v25 = vadd.f32 %v1776_v23, %v555_v12  ;;  %v1952_v28 = vmax.f32 %v2930_v19, 0.0 }
 0x1b2   : > { %v1955_v27 = vmax.f32 %v2931_v22, 0.0  ;;  %v2901_v22 = vld [vmem:[%s4470_s6] ss:$0 sm:$0xff] }
 0x1b3   : > { %v1956_v29 = vmax.f32 %v2932_v25, 0.0 }
 0x1b4   : > { %v1959_v31 = vpack.c.bf16 %v1955_v27, %v1951_v26 }
 0x1b5   : > { %v1960_v33 = vpack.c.bf16 %v1956_v29, %v1952_v28  ;;  %v1942_v34 = vpop.f32.mrb[4].mxu0 }
 0x1b6   : > { %v2934_v36 = vadd.f32 %v2933_v30, %v1942_v34  ;;  %v1944_v37 = vpop.f32.mrb[5].mxu0 }
 0x1b7   : > { %v2936_v39 = vadd.f32 %v2935_v32, %v1944_v37  ;;  %v1946_v40 = vpop.f32.mrb[6].mxu0  ;;  %2311 = vmatprep.mubr.bf16.mxu0 %v1960_v33  ;;  %v2912_v32 = vld [vmem:[%s4472_s8] ss:$0 sm:$0xff] }
 0x1b8   : > { %v2938_v41 = vadd.f32 %v2937_v35, %v1946_v40  ;;  %v1948_v42 = vpop.f32.mrb[7].mxu0  ;;  %2312 = vmatmul.mubr.bf16.vlgmr.msra.gmra.mrb[8].mxu0 %v1959_v31  ;;  %v1953_v44 = vmax.f32 %v2934_v36, 0.0 }
 0x1b9   : > { %v2940_v43 = vadd.f32 %v2939_v38, %v1948_v42  ;;  %v1954_v46 = vmax.f32 %v2936_v39, 0.0 }
 0x1ba   : > { %v1957_v45 = vmax.f32 %v2938_v41, 0.0 }
 0x1bb   : > { %v1958_v47 = vmax.f32 %v2940_v43, 0.0 }
 0x1bc   : > { %v1961_v48 = vpack.c.bf16 %v1957_v45, %v1953_v44 }
 0x1bd   : > { %v1962_v49 = vpack.c.bf16 %v1958_v47, %v1954_v46 }
 0x1bf   : > { %2900 = vmatprep.mubr.msk.bf16.mxu1 %vm2275_vm1, %v1962_v49 }
 0x1c0   : > { %2355 = vmatmul.mubr.bf16.vlgmr.msra.gmra.mrb[4].mxu1 %v1961_v48 }
 0x1c1   : > { %2454 = vmatpush1.bf16.msra.mxu1 %v3399_v50 }
 0x1c2   : > { %2455 = vmatprep.subr.bf16.mxu1 %v3473_v13 }
 0x1c5   : > { %2456 = vmatpush1.bf16.msra.mxu1 %v3400_v51 }
 0x1c6   : > { %2457 = vmatprep.subr.bf16.mxu1 %v3473_v13 }
 0x1c9   : > { %2458 = vmatpush1.bf16.msra.mxu1 %v3401_v52 }
 0x1ca   : > { %2459 = vmatprep.subr.bf16.mxu1 %v3473_v13 }
 0x1cd   : > { %2460 = vmatpush1.bf16.msra.mxu1 %v3402_v53 }
 0x1ce   : > { %2461 = vmatprep.subr.bf16.mxu1 %v3473_v13 }
 0x1d1   : > { %2462 = vmatpush1.bf16.msra.mxu1 %v3403_v54 }
 0x1d2   : > { %2463 = vmatprep.subr.bf16.mxu1 %v3473_v13 }
 0x1d5   : > { %2464 = vmatpush1.bf16.msra.mxu1 %v3404_v55 }
 0x1d6   : > { %2465 = vmatprep.subr.bf16.mxu1 %v3473_v13 }
 0x1d9   : > { %2466 = vmatpush1.bf16.msra.mxu1 %v3405_v56 }
 0x1da   : > { %2467 = vmatprep.subr.bf16.mxu1 %v3473_v13 }
 0x1dd   : > { %2468 = vmatpush1.bf16.msra.mxu1 %v3406_v57 }
 0x1de   : > { %2469 = vmatprep.subr.bf16.mxu1 %v3473_v13  ;;  %v2022_v13 = vrot.slane %v2013_v59, %v554_v9  ;;  %v3408_v9 = vld [vmem:[%s4471_s7] sm:$0xff]  }
 0x1e1   : > { %2470 = vmatpush1.bf16.msra.mxu1 %v3407_v58 }
 0x1e2   : > { %2923 = vmatprep.subr.bf16.mxu1 %v3474_v6 }
 0x28b   : > { %v2313_v61 = vpop.f32.mrb[8].mxu0 }
 0x28c   : > { %v2314_v62 = vadd.f32 %v2313_v61, %v2018_v60  ;;  %v2315_v63 = vpop.f32.mrb[9].mxu0 }
 0x28d   : > { %v2317_v0 = vpop.f32.mrb[10].mxu0  ;;  %v2316_v3 = vadd.f32 %v2315_v63, %v2022_v13 }
 0x28e   : > { %v2318_v1 = vadd.f32 %v2317_v0, %v2018_v60  ;;  %v2319_v2 = vpop.f32.mrb[11].mxu0 }
 0x28f   : > { %v2320_v10 = vadd.f32 %v2319_v2, %v2022_v13 }
 0x293   : > { %v2356_v4 = vpop.f32.mrb[4].mxu1 }
 0x294   : > { %v2357_v5 = vadd.f32 %v2356_v4, %v2314_v62  ;;  %v2358_v7 = vpop.f32.mrb[5].mxu1 }
 0x295   : > { %v2359_v11 = vadd.f32 %v2358_v7, %v2316_v3  ;;  %v2360_v12 = vpop.f32.mrb[6].mxu1 }
 0x296   : > { %v2361_v14 = vadd.f32 %v2360_v12, %v2318_v1  ;;  %v2362_v15 = vpop.f32.mrb[7].mxu1  ;;  %v2365_v8 = vmax.f32 %v2357_v5, 0.0 }
 0x297   : > { %v2363_v16 = vadd.f32 %v2362_v15, %v2320_v10  ;;  %v2366_v18 = vmax.f32 %v2359_v11, 0.0 }
 0x298   : > { %v2367_v17 = vmax.f32 %v2361_v14, 0.0 }
 0x299   : > { %v2368_v19 = vmax.f32 %v2363_v16, 0.0 }
 0x29a   : > { %v2369_v20 = vpack.c.bf16 %v2367_v17, %v2365_v8 }
 0x29b   : > { %v2370_v21 = vpack.c.bf16 %v2368_v19, %v2366_v18 }
 0x29d   : > { %2911 = vmatprep.mubr.msk.bf16.mxu1 %vm2275_vm1, %v2370_v21 }
 0x29e   : > { %2486 = vmatmul.mubr.bf16.vlgmr.msra.gmra.mrb[8].mxu1 %v2369_v20 }
 0x29f   : > { %2924 = vmatpush3.bf16.msra.mxu1 %v3408_v9  ;;  %2925 = vmatprep.mubr.msk.bf16.mxu1 %vm3475_vm2, %v3474_v6 }
 0x371   : > { %v2487_v23 = vpop.f32.mrb[8].mxu1 }
 0x372   : > { %v2488_v24 = vadd.f32 %v2901_v22, %v2487_v23  ;;  %v2489_v25 = vpop.f32.mrb[9].mxu1 }
 0x373   : > { %v2490_v26 = vpop.f32.mrb[10].mxu1 }
 0x374   : > { %v2491_v27 = vadd.f32 %v2901_v22, %v2490_v26  ;;  %v2492_v28 = vpop.f32.mrb[11].mxu1  ;;  %v2494_v29 = vmax.f32 %v2488_v24, 0.0 }
 0x376   : > { %v2495_v30 = vmax.f32 %v2491_v27, 0.0 }
 0x378   : > { %v2496_v31 = vpack.c.bf16 %v2495_v30, %v2494_v29 }
 0x37a   : > { %2926 = vmatmul.mubr.msk.bf16.vlgmr.msra.gmra.mrb[12].mxu1 %vm2275_vm1, %v2496_v31 }
 0x44d   : > { %v2549_v33 = vpop.f32.mrb[12].mxu1 }
 0x44e   : > { %v2550_v34 = vadd.f32 %v2912_v32, %v2549_v33  ;;  %v2927_v35 = vpop.f32.mrb[13].mxu1 }
 0x44f   : > { %v2552_v36 = vpop.f32.mrb[14].mxu1 }
 0x450   : > { %2556 = vst.msk [vmem:[%s328_s23] sm:$0xff] %vm1603_vm0, %v2550_v34  ;;  %v2553_v37 = vadd.f32 %v2912_v32, %v2552_v36  ;;  %v2928_v38 = vpop.f32.mrb[15].mxu1 }
 0x452   : > { %2557 = vst.msk [vmem:[%s328_s23 + $0x8] sm:$0xff] %vm1603_vm0, %v2553_v37 }
 0x453   : > { %3422 = shalt.err (!%p3419_p3)
}
 0x454   : > { %s3423_s14 = scalar_lea.hbm %s4419_s28, 256  ;;  %s3427_s25 = scalar_lea.hbm %s4473_s9, 512 }
 0x455   : > { %p3424_p4 = scmp.ne.s32.totalorder %s4419_s28, %s3423_s14  ;;  %p3428_p9 = scmp.lt.u32.totalorder %s4419_s28, %s4473_s9 }
 0x456   : > { %p3429_p10 = scmp.lt.u32.totalorder %s3427_s25, %s3423_s14  ;;  %p3431_p12 = scmp.lt.u32.totalorder %s3423_s14, %s4419_s28 }
 0x457   : > { %p3425_p7 = pnand %p3424_p4, %p3567_p5 }
 0x458   : > { %p3430_p11 = por %p3429_p10, %p3428_p9 }
 0x459   : > { %p3426_p8 = pneg %p3425_p7 }
 0x45a   : > { %p3432_p13 = por %p3431_p12, %p3430_p11 }
 0x45c   : > { %p3433_p0 = pnand %p3432_p13, %p3426_p8 }
 0x45e   : > { %3436 = shalt.err (!%p3433_p0)
}
 0x45f   : > { %s3477_s22 = smov 128   ;;  %s3478_s29 = smov 8  }
 0x460   : > { %2970 = dma.vmem_to_hbm [thread:$0]  (%p3567_p5), %s4414_s24, 256, %s4419_s28, %s4423_s13, %s3477_s22, %s3477_s22, %s3478_s29  }
 0x461 PF: > { %p2976_p1 = scmp.ge.s32.totalorder %s3471_s12, 2  ;;  %s2587_s21 = sand.u32 1, %s3459_s30  }
 0x462   : > { %s2588_s17 = scalar_lea.sflag [#allocation3], %s2587_s21 }
 0x463   : > { %p2973_p2 = pnand %p2976_p1, %p3571_p6 }
 0x465   : > { %3454 = dma.done.wait (!%p2973_p2), %s2588_s17, 256  }
 0x466   : > { %3456 = vsyncadd (!%p2973_p2), %s2588_s17, 4294967040  ;;  %p19_p3 = scmp.ge.s32.totalorder %s3554_s15, 4   ;;  %s4476_s30 = smov %s3463_s10 }
 0x467   : > { %s4477_s10 = smov %s3467_s11  ;;  %s4478_s11 = smov %s3565_s18 }
 0x468   : > { %s4479_s12 = smov %s3554_s15  ;;  %21 = sbr.rel (!%p19_p3) target bundleno = 3 (0x3), region = 91 }
 0x46f   :  { %2593 = vsyncpa [#allocation3], 1 }
 0x470   :  { %2595 = vsyncpa [#allocation3 + $0x1], 1 }

</bundles_post_ra>
